<compile_context>
chip_gen: v7x
topology: tpu7x:2x2x1
jax: 0.10.0
libtpu: 0.0.40
codegen_flags: <defaults>
</compile_context>

<pallas_src>
import jax
import jax.numpy as jnp
import numpy as np
from jax import lax
from jax.experimental import pallas as pl
from jax.experimental.pallas import tpu as pltpu

N = 23                               # node count hard-coded in the PyTorch module
P = N * N                            # 529 flattened (row, col) pairs
PPAD = ((P + 127) // 128) * 128      # 640: lane-aligned flattened width


# -----------------------------------------------------------------------------
# Pallas kernel: chain of L fused ResGAT layers on the flattened state.
# -----------------------------------------------------------------------------
def resgat_fused_kernel(d_ref, wbig_ref, out_ref):
    # d_ref    : (TB, PPAD)      f32   flattened last-time-slice block of flow_x
    # wbig_ref : (L, PPAD, PPAD) bf16  per-layer folded weights (residual on diagonal)
    # out_ref  : (TB, PPAD)      f32
    num_layers = wbig_ref.shape[0]
    d = d_ref[...]
    if num_layers <= 4:
        # Small layer counts: fully unrolled; wbig_ref[l] is a static zero-cost view
        # whose tiles stream straight into the MXU.
        for l in range(num_layers):
            d = jnp.dot(d.astype(jnp.bfloat16), wbig_ref[l],
                        preferred_element_type=jnp.float32)
    else:
        # Large res_gat_num: bound per-layer live ranges (vreg pressure, compile time).
        def body(l, d_carry):
            w = wbig_ref[l]
            return jnp.dot(d_carry.astype(jnp.bfloat16), w,
                           preferred_element_type=jnp.float32)
        d = lax.fori_loop(0, num_layers, body, d)
    out_ref[...] = d


def _batch_tiling(batch):
    """Return (padded_rows, row_block).

    Rows are independent (padded rows are computed then discarded), so pad the batch
    to a multiple of 8 and pick the largest TB <= 512 that still gives >= 2 grid
    steps (v7x megacore sharding, well-filled MXU M dim, small padding waste)."""
    bpad = ((batch + 7) // 8) * 8
    if bpad < 16:
        return bpad, bpad                         # too small to split across 2 cores
    nsteps = max(2, -(-bpad // 512))              # >= 2 steps, TB <= 512
    tb = 8 * (-(-bpad // (8 * nsteps)))           # multiple of 8
    return nsteps * tb, tb


def resgat_pallas(d_flat, wbig, tb):
    """d_flat: (Bpad, PPAD) f32, wbig: (L, PPAD, PPAD) bf16 -> (Bpad, PPAD) f32."""
    bpad = d_flat.shape[0]
    num_layers = wbig.shape[0]
    grid = (bpad // tb,)
    # Explicit VMEM budget: bf16 weights resident (worst case 2 pipeline buffers) +
    # double-buffered f32 d in/out blocks + headroom.  For small L this equals the
    # 32 MiB default; for large L it scales up instead of silently failing to fit.
    wbig_bytes = 2 * num_layers * PPAD * PPAD * 2
    d_bytes = 2 * 2 * tb * PPAD * 4
    vmem_limit = min(max(int(1.25 * (wbig_bytes + d_bytes)) + (4 << 20), 32 << 20),
                     120 << 20)
    return pl.pallas_call(
        resgat_fused_kernel,
        out_shape=jax.ShapeDtypeStruct((bpad, PPAD), jnp.float32),
        grid=grid,
        in_specs=[
            pl.BlockSpec((tb, PPAD), lambda b: (b, 0)),
            # Constant block index -> weights DMA'd once, resident across the grid.
            pl.BlockSpec((num_layers, PPAD, PPAD), lambda b: (0, 0, 0)),
        ],
        out_specs=pl.BlockSpec((tb, PPAD), lambda b: (b, 0)),
        compiler_params=pltpu.CompilerParams(
            dimension_semantics=("parallel",),    # shards batch over v7x's 2 TCs
            vmem_limit_bytes=vmem_limit),
    )(d_flat, wbig)


# -----------------------------------------------------------------------------
# Param-only precompute (hoisted out of the kernel / forward hot path).
# -----------------------------------------------------------------------------
def _normalize_attention(W, mask):
    """MyGAT/MyGAT1 attention: clamp-subtracted row min, adjacency mask, row-normalize.
    (Matches torch exactly: no epsilon guard on the masked row sum.)"""
    min_v = jnp.min(W, axis=-1, keepdims=True)
    min_v = jnp.where(min_v > 0.0, 0.0, min_v)
    attn = (W - min_v) * mask[None, :, :]
    return attn / jnp.sum(attn, axis=-1, keepdims=True)


def precompute_layer_weights(layers, adj):
    """Fold each ResGAT layer into a single bf16 Wbig on the flattened index f(r,c)=r*N+c.

    out[b,i,m] = coef_d[i,m]*d[b,i,m] + c1[i,m]*sum_n attn0[i,m,n]*d[b,n,i]
                                      + c2[i,m]*sum_n attn1[i,m,n]*d[b,i,n]
    becomes    out_flat = d_flat @ Wbig   (residual folded into the diagonal).
    """
    adj = adj.at[jnp.arange(N), jnp.arange(N)].set(1.0)        # torch: adj[i][i] = 1
    mask = (adj != 0).astype(jnp.float32)
    eye = jnp.eye(N, dtype=jnp.float32)
    wbigs = []
    for p in layers:
        attn0 = _normalize_attention(p["W0"], mask)            # (N, N, N)  MyGAT
        attn1 = _normalize_attention(p["W1"], mask)            # (N, N, N)  MyGAT1
        yz3 = p["a3"] / jnp.sum(p["a3"], axis=-1, keepdims=True)         # (N, N, 2)
        yzR = p["aR"][0] / jnp.sum(p["aR"][0], axis=-1, keepdims=True)   # (N, N, 2)
        coef_d = yzR[..., 0]
        c1 = yzR[..., 1] * yz3[..., 0]
        c2 = yzR[..., 1] * yz3[..., 1]
        # Wbig[f(r,c), f(i,m)] = c1[i,m]*attn0[i,m,r]*[c==i] + c2[i,m]*attn1[i,m,c]*[r==i]
        t1 = jnp.einsum("imr,ci->rcim", attn0 * c1[..., None], eye)
        t2 = jnp.einsum("imc,ri->rcim", attn1 * c2[..., None], eye)
        w = (t1 + t2).reshape(P, P)
        # Fold the residual coefficient into the diagonal (first P entries only, so
        # zero-padded lanes 529..639 stay exactly zero through every layer).
        w = w + jnp.diag(coef_d.reshape(P))
        wbigs.append(w)
    wbig = jnp.pad(jnp.stack(wbigs), ((0, 0), (0, PPAD - P), (0, PPAD - P)))
    # bf16 MXU operands: native on v5e/v6e/v7x; halves resident VMEM + weight DMA.
    return wbig.astype(jnp.bfloat16)


@jax.jit
def res_gat_by_num(flow_x, wbig):
    """ResGATByNum.forward with precomputed folded weights: (B,N,N,T) -> (B,N,N,1)."""
    batch = flow_x.shape[0]
    d = flow_x[:, :, :, -1].reshape(batch, P).astype(jnp.float32)
    bpad, tb = _batch_tiling(batch)
    d = jnp.pad(d, ((0, bpad - batch), (0, PPAD - P)))         # lane-dense + row pad
    out = resgat_pallas(d, wbig, tb)
    return out[:batch, :P].reshape(batch, N, N)[..., None]


def res_gat_forward(flow_x, adj, layers):
    """Convenience wrapper matching the torch call signature (precompute inline)."""
    wbig = precompute_layer_weights(layers, adj)
    return res_gat_by_num(flow_x, wbig)


# -----------------------------------------------------------------------------
# Parameters (uniform [0,1) like torch.rand) and an independent float64 reference.
# -----------------------------------------------------------------------------
def init_params(key, res_gat_num):
    layers = []
    for _ in range(res_gat_num):
        key, k0, k1, k2, k3 = jax.random.split(key, 5)
        layers.append(dict(
            W0=jax.random.uniform(k0, (N, N, N), dtype=jnp.float32),     # MyGAT.W
            W1=jax.random.uniform(k1, (N, N, N), dtype=jnp.float32),     # MyGAT1.W
            a3=jax.random.uniform(k2, (N, N, 2), dtype=jnp.float32),     # MyGAT3_1.a
            aR=jax.random.uniform(k3, (1, N, N, 2), dtype=jnp.float32),  # ResGAT.a
        ))
        # MyGAT.B / MyGAT1.B parameters are unused by the torch forward -> omitted.
    return layers


def reference_numpy(flow_x, adj, layers):
    """Literal float64 NumPy transcription of the torch forward (independent path)."""
    A = np.asarray(adj, dtype=np.float64).copy()
    np.fill_diagonal(A, 1.0)
    out = np.asarray(flow_x, dtype=np.float64)
    for p in layers:
        d = out[:, :, :, -1]                                   # (B, N, N)
        batch = d.shape[0]
        results = {}
        for name, W, dd in (("gat", p["W0"], d),
                            ("gat1", p["W1"], np.transpose(d, (0, 2, 1)))):
            W = np.asarray(W, dtype=np.float64)
            minv = W.min(axis=-1, keepdims=True)
            minv = np.where(minv > 0.0, 0.0, minv)
            attn = (W - minv) * (A != 0)[None, :, :]
            attn = attn / attn.sum(axis=-1, keepdims=True)
            x = np.zeros((batch, N, N))
            for b in range(batch):
                for i in range(N):
                    x[b, i, :] = attn[i] @ dd[b, :, i]
            results[name] = x
        a3 = np.asarray(p["a3"], dtype=np.float64)
        aR = np.asarray(p["aR"], dtype=np.float64)[0]
        yz3 = a3 / a3.sum(-1, keepdims=True)
        yzR = aR / aR.sum(-1, keepdims=True)
        x3 = results["gat"] * yz3[..., 0] + results["gat1"] * yz3[..., 1]
        out = (d * yzR[..., 0] + x3 * yzR[..., 1])[..., None]
    return out


if __name__ == "__main__":
    key = jax.random.PRNGKey(0)
    key, kx, ka, kp = jax.random.split(key, 4)

    # B=20 exercises both the batch padding path (20 -> 32 rows) and a multi-step
    # grid (2 steps of TB=16), i.e. the v7x megacore sharding path.
    B, T, res_gat_num = 20, 4, 2
    flow_x = jax.random.uniform(kx, (B, N, N, T), dtype=jnp.float32)
    adj = (jax.random.uniform(ka, (N, N)) > 0.5).astype(jnp.float32)
    layers = init_params(kp, res_gat_num)

    # Param-only precompute: done once, reused across every forward call.
    wbig = precompute_layer_weights(layers, adj)

    out = jax.block_until_ready(res_gat_by_num(flow_x, wbig))
    assert out.shape == (B, N, N, 1)

    # Tolerance reflects bf16 MXU operands (f32 accumulation): folded weights and
    # activations are row-normalized values in [0,1], so per-layer relative error is
    # bounded by a few bf16 ulps (~0.4%); rtol=2e-2 is comfortably above that while
    # still catching any structural error.
    ref = reference_numpy(flow_x, adj, layers)
    np.testing.assert_allclose(np.asarray(out, dtype=np.float64), ref,
                               rtol=2e-2, atol=2e-3)

    print("KERNEL_OK")
</pallas_src>

<mosaic_0001>
module attributes {stable_mosaic.version = 11 : i64} {
  func.func @resgat_fused_kernel(%arg0: i32, %arg1: memref<16x640xf32, #tpu.memory_space<vmem>>, %arg2: memref<2x640x640xbf16, #tpu.memory_space<vmem>>, %arg3: memref<16x640xf32, #tpu.memory_space<vmem>>) attributes {dimension_semantics = [#tpu.dimension_semantics<parallel>], iteration_bounds = array<i64: 2>, scalar_prefetch = 0 : i64, scratch_operands = 0 : i64, tpu.core_type = #tpu.core_type<tc>, window_params = [{transform_indices = @transform_0, window_bounds = array<i64: 16, 640>}, {pipeline_mode = #tpu.pipeline_mode<synchronous>, transform_indices = @transform_1, window_bounds = array<i64: 2, 640, 640>}, {transform_indices = @transform_2, window_bounds = array<i64: 16, 640>}]} {
    %c0 = arith.constant 0 : index
    %c0_0 = arith.constant 0 : index
    %0 = vector.load %arg1[%c0, %c0_0] : memref<16x640xf32, #tpu.memory_space<vmem>>, vector<16x640xf32>
    %1 = arith.truncf %0 : vector<16x640xf32> to vector<16x640xbf16>
    %c0_1 = arith.constant 0 : index
    %c0_2 = arith.constant 0 : index
    %c0_3 = arith.constant 0 : index
    %2 = vector.load %arg2[%c0_1, %c0_2, %c0_3] : memref<2x640x640xbf16, #tpu.memory_space<vmem>>, vector<1x640x640xbf16>
    %3 = vector.shape_cast %2 : vector<1x640x640xbf16> to vector<640x640xbf16>
    %cst = arith.constant dense<0.000000e+00> : vector<16x640xf32>
    %4 = tpu.matmul %1, %3, %cst {dimension_numbers = #tpu.dot_dimension_numbers<[1], [0], [0], [1], [0, 0, 1, 1], [], []>} : vector<16x640xbf16>, vector<640x640xbf16>, vector<16x640xf32> -> vector<16x640xf32>
    %5 = arith.truncf %4 : vector<16x640xf32> to vector<16x640xbf16>
    %c1 = arith.constant 1 : index
    %c0_4 = arith.constant 0 : index
    %c0_5 = arith.constant 0 : index
    %6 = vector.load %arg2[%c1, %c0_4, %c0_5] : memref<2x640x640xbf16, #tpu.memory_space<vmem>>, vector<1x640x640xbf16>
    %7 = vector.shape_cast %6 : vector<1x640x640xbf16> to vector<640x640xbf16>
    %cst_6 = arith.constant dense<0.000000e+00> : vector<16x640xf32>
    %8 = tpu.matmul %5, %7, %cst_6 {dimension_numbers = #tpu.dot_dimension_numbers<[1], [0], [0], [1], [0, 0, 1, 1], [], []>} : vector<16x640xbf16>, vector<640x640xbf16>, vector<16x640xf32> -> vector<16x640xf32>
    %c0_7 = arith.constant 0 : index
    %c0_8 = arith.constant 0 : index
    %9 = vector.load %arg3[%c0_7, %c0_8] : memref<16x640xf32, #tpu.memory_space<vmem>>, vector<16x640xf32>
    tpu.vector_store %arg3[%c0_7, %c0_8], %8 {strides = array<i32>} : memref<16x640xf32, #tpu.memory_space<vmem>>, vector<16x640xf32>,
    return
  }
  func.func @transform_0(%arg0: i32) -> (i32, i32) {
    %c0_i32 = arith.constant 0 : i32
    %c0_i32_0 = arith.constant 0 : i32
    return %arg0, %c0_i32 : i32, i32
  }
  func.func @transform_1(%arg0: i32) -> (i32, i32, i32) {
    %c0_i32 = arith.constant 0 : i32
    %c0_i32_0 = arith.constant 0 : i32
    %c0_i32_1 = arith.constant 0 : i32
    %c0_i32_2 = arith.constant 0 : i32
    return %c0_i32, %c0_i32_0, %c0_i32_1 : i32, i32, i32
  }
  func.func @transform_2(%arg0: i32) -> (i32, i32) {
    %c0_i32 = arith.constant 0 : i32
    %c0_i32_0 = arith.constant 0 : i32
    return %arg0, %c0_i32 : i32, i32
  }
}

</mosaic_0001>

<bundles_post_ra>
// kernel: squeeze.1
= control target key start
LH: loop header
LB: loop body
LE: loop exit
PB: predicated region body
PF: predicated region fallthrough
CT: control target
= control target key end

     0   :  { %vm34_vm0 = vcmask 23552   ;;  %vm4_vm1 = vcmask 1047556   ;;  %vm96_vm2 = vcmask 48128   ;;  %s1058_s14 = smov 125   ;;  %vm156_vm3 = vcmask 105472   ;;  %s1059_s6 = smov 122   ;;  %s1897_s0 = inlined_call_operand.vmem [shape: f32[20,23,23], index: 0, kind: input, shape index: {}]   ;;  %s1898_s1 = inlined_call_operand.vmem [shape: f32[20,529], index: 1, kind: output, shape index: {}]  }
   0x1   :  { %v828_v0 = vld [vmem:[%s1897_s0 + $0x12b] ss:$24 sm:$0xf]   ;;  %v832_v9 = vld [vmem:[%s1897_s0 + $0x16] ss:$24 sm:$0xf]  }
   0x2   :  { %v829_v1 = vld [vmem:[%s1897_s0 + $0x18b] ss:$24 sm:$0xf]   ;;  %v833_v10 = vld [vmem:[%s1897_s0 + $0x16] ss:$24 sm:$0xf0]  }
   0x3   :  { %v75_v2 = vsel %vm34_vm0, %v829_v1, %v828_v0  ;;  %v814_v3 = vld [vmem:[%s1897_s0 + $0x18b] ss:$24 sm:$0xf]   ;;  %v89_v12 = vsel %vm4_vm1, %v833_v10, %v832_v9  ;;  %v834_v13 = vld [vmem:[%s1897_s0 + $0xd6] ss:$24 sm:$0xf]  }
   0x4   :  { %v815_v4 = vld [vmem:[%s1897_s0 - $0x55] ss:$24 sm:$0xf0]   ;;  %76 = vrot.lane.b32.xlu1 %v75_v2, %s1058_s14  ;;  %v835_v14 = vld [vmem:[%s1897_s0 + $0xd6] ss:$24 sm:$0xf0]  }
   0x5   :  { %v27_v5 = vsel %vm4_vm1, %v815_v4, %v814_v3  ;;  %v816_v6 = vld [vmem:[%s1897_s0 + $0xb] ss:$24 sm:$0xf]   ;;  %v95_v15 = vsel %vm4_vm1, %v835_v14, %v834_v13  ;;  %v845_v23 = vld [vmem:[%s1897_s0 + $0x196] ss:$24 sm:$0xf]  }
   0x6   :  { %v817_v7 = vld [vmem:[%s1897_s0 + $0xb] ss:$24 sm:$0xf0]   ;;  %v97_v18 = vsel %vm96_vm2, %v95_v15, %v89_v12  ;;  %v846_v24 = vld [vmem:[%s1897_s0 + $0x76] ss:$24 sm:$0xf]  }
   0x7   :  { %v33_v8 = vsel %vm4_vm1, %v817_v7, %v816_v6  ;;  %v821_v16 = vld [vmem:[%s1897_s0 + $0x6b] ss:$24 sm:$0xf]   ;;  %v135_v26 = vsel %vm96_vm2, %v846_v24, %v845_v23  ;;  %v838_v27 = vld [vmem:[%s1897_s0 + $0xd6] ss:$24 sm:$0xf]  }
   0x8   :  { %v35_v11 = vsel %vm34_vm0, %v33_v8, %v27_v5  ;;  %v822_v17 = vld [vmem:[%s1897_s0 + $0x6b] ss:$24 sm:$0xf0]   ;;  %98 = vrot.lane.b32.xlu1 %v97_v18, %s1059_s6  ;;  %v839_v28 = vld [vmem:[%s1897_s0 + $0xd6] ss:$24 sm:$0xf0]  }
   0x9   :  { %36 = vrot.lane.b32.xlu0 %v35_v11, %s1058_s14  ;;  %v51_v19 = vsel %vm4_vm1, %v822_v17, %v821_v16  ;;  %v823_v20 = vld [vmem:[%s1897_s0 + $0xcb] ss:$24 sm:$0xf]   ;;  %v111_v29 = vsel %vm4_vm1, %v839_v28, %v838_v27  ;;  %v840_v30 = vld [vmem:[%s1897_s0 + $0x196] ss:$24 sm:$0xf]  }
   0xa   :  { %v824_v21 = vld [vmem:[%s1897_s0 + $0xcb] ss:$24 sm:$0xf0]   ;;  %v841_v31 = vld [vmem:[%s1897_s0 - $0x4a] ss:$24 sm:$0xf0]  }
   0xb   :  { %v57_v22 = vsel %vm4_vm1, %v824_v21, %v823_v20  ;;  %v117_v32 = vsel %vm4_vm1, %v841_v31, %v840_v30  ;;  %v854_v33 = vld [vmem:[%s1897_s0 + $0xc5] ss:$24 sm:$0xf]   ;;  %vm213_vm4 = vcmask 130048   ;;  %s1060_s8 = smov 115   ;;  %s1061_s25 = smov 112  }
   0xc   :  { %v59_v25 = vsel %vm34_vm0, %v57_v22, %v51_v19  ;;  %136 = vrot.lane.b32.xlu1 %v135_v26, %s1059_s6  ;;  %v119_v34 = vsel %vm96_vm2, %v117_v32, %v111_v29  ;;  %v855_v35 = vld [vmem:[%s1897_s0 + $0xc5] ss:$24 sm:$0xf0]   ;;  %v864_v46 = vld [vmem:[%s1897_s0 + $0xd0] ss:$24 sm:$0xf]  }
   0xd   :  { %60 = vrot.lane.b32.xlu0 %v59_v25, %s1058_s14  ;;  %v856_v36 = vld [vmem:[%s1897_s0 + $0xc5] ss:$24 sm:$0xf]   ;;  %v170_v37 = vsel %vm4_vm1, %v855_v35, %v854_v33  ;;  %v865_v48 = vld [vmem:[%s1897_s0 + $0xd0] ss:$24 sm:$0xf0]  }
   0xe   :  { %v857_v38 = vld [vmem:[%s1897_s0 + $0xc5] ss:$24 sm:$0xf0]   ;;  %v866_v49 = vld [vmem:[%s1897_s0 + $0x190] ss:$24 sm:$0xf]   ;;  %v206_v51 = vsel %vm4_vm1, %v865_v48, %v864_v46 }
   0xf   :  { %v849_v39 = vld [vmem:[%s1897_s0 + $0x5] ss:$24 sm:$0xf]   ;;  %v176_v40 = vsel %vm4_vm1, %v857_v38, %v856_v36  ;;  %v867_v52 = vld [vmem:[%s1897_s0 - $0x50] ss:$24 sm:$0xf0]  }
  0x10   :  { %v850_v41 = vld [vmem:[%s1897_s0 + $0x5] ss:$24 sm:$0xf0]   ;;  %v178_v43 = vsel %vm156_vm3, %v176_v40, %v170_v37  ;;  %v212_v54 = vsel %vm4_vm1, %v867_v52, %v866_v49  ;;  %v879_v56 = vld [vmem:[%s1897_s0 + $0x70] ss:$24 sm:$0xf]  }
  0x11   :  { %120 = vrot.lane.b32.xlu0 %v119_v34, %s1059_s6  ;;  %v851_v42 = vld [vmem:[%s1897_s0 + $0x5] ss:$24 sm:$0xf]   ;;  %v149_v44 = vsel %vm4_vm1, %v850_v41, %v849_v39  ;;  %179 = vrot.lane.b32.xlu1 %v178_v43, %s1060_s8  ;;  %v214_v57 = vsel %vm213_vm4, %v212_v54, %v206_v51  ;;  %v880_v59 = vld [vmem:[%s1897_s0 + $0x130] ss:$24 sm:$0xf]  }
  0x12   :  { %v852_v45 = vld [vmem:[%s1897_s0 + $0x5] ss:$24 sm:$0xf0]   ;;  %v871_v60 = vld [vmem:[%s1897_s0 + $0x190] ss:$24 sm:$0xf]   ;;  %v256_v63 = vsel %vm213_vm4, %v880_v59, %v879_v56 }
  0x13   :  { %v155_v47 = vsel %vm4_vm1, %v852_v45, %v851_v42  ;;  %v860_v53 = vld [vmem:[%s1897_s0 + $0x185] ss:$24 sm:$0xf]   ;;  %v872_v61 = vld [vmem:[%s1897_s0 - $0x50] ss:$24 sm:$0xf0]  }
  0x14   :  { %v157_v50 = vsel %vm156_vm3, %v155_v47, %v149_v44  ;;  %v861_v55 = vld [vmem:[%s1897_s0 + $0x185] ss:$24 sm:$0xf]   ;;  %v873_v62 = vld [vmem:[%s1897_s0 + $0x70] ss:$24 sm:$0xf]   ;;  %v230_v0 = vsel %vm4_vm1, %v872_v61, %v871_v60 }
  0x15   :  { %158 = vrot.lane.b32.xlu0 %v157_v50, %s1060_s8  ;;  %v192_v58 = vsel %vm156_vm3, %v861_v55, %v860_v53  ;;  %215 = vrot.lane.b32.xlu1 %v214_v57, %s1061_s25  ;;  %v874_v1 = vld [vmem:[%s1897_s0 + $0x70] ss:$24 sm:$0xf0]   ;;  %v886_v3 = vld [vmem:[%s1897_s0 + $0xca] ss:$24 sm:$0xf]  }
  0x16   :  { %v236_v2 = vsel %vm4_vm1, %v874_v1, %v873_v62  ;;  %v887_v4 = vld [vmem:[%s1897_s0 + $0xca] ss:$24 sm:$0xf0]   ;;  %v891_v9 = vld [vmem:[%s1897_s0 + $0xd5] ss:$24 sm:$0xf]  }
  0x17   :  { %v238_v5 = vsel %vm213_vm4, %v236_v2, %v230_v0  ;;  %v883_v6 = vld [vmem:[%s1897_s0 + $0xa] ss:$24 sm:$0xf]   ;;  %v281_v8 = vsel %vm4_vm1, %v887_v4, %v886_v3  ;;  %v892_v10 = vld [vmem:[%s1897_s0 + $0xd5] ss:$24 sm:$0xf0]  }
  0x18   :  { %v884_v7 = vld [vmem:[%s1897_s0 + $0xa] ss:$24 sm:$0xf0]   ;;  %s1062_s14 = smov 102   ;;  %v299_v12 = vsel %vm4_vm1, %v892_v10, %v891_v9  ;;  %s1063_s18 = smov 99   ;;  %vm6_vm5 = vcmask 187392  }
  0x19   :  { %193 = vrot.lane.b32.xlu0 %v192_v58, %s1060_s8  ;;  %257 = vrot.lane.b32.xlu1 %v256_v63, %s1061_s25  ;;  %v270_v11 = vsel %vm4_vm1, %v884_v7, %v883_v6  ;;  %v889_v13 = vld [vmem:[%s1897_s0 + $0x18a] ss:$24 sm:$0xf]   ;;  %v894_v14 = vld [vmem:[%s1897_s0 + $0x195] ss:$24 sm:$0xf]  }
  0x1a   :  { %v895_v15 = vld [vmem:[%s1897_s0 - $0x4b] ss:$24 sm:$0xf0]   ;;  %v902_v17 = vld [vmem:[%s1897_s0 + $0xc4] ss:$24 sm:$0xf]  }
  0x1b   :  { %v898_v16 = vld [vmem:[%s1897_s0 + $0x75] ss:$24 sm:$0xf]   ;;  %v903_v18 = vld [vmem:[%s1897_s0 + $0xc4] ss:$24 sm:$0xf0]   ;;  %v310_v19 = vsel %vm4_vm1, %v895_v15, %v894_v14 }
  0x1c   :  { %v900_v20 = vld [vmem:[%s1897_s0 + $0x4] ss:$24 sm:$0xf]   ;;  %v340_v22 = vsel %vm4_vm1, %v903_v18, %v902_v17  ;;  %v907_v23 = vld [vmem:[%s1897_s0 + $0x18f] ss:$24 sm:$0xf]  }
  0x1d   :  { %239 = vrot.lane.b32.xlu0 %v238_v5, %s1061_s25  ;;  %282 = vrot.lane.b32.xlu1 %v281_v8, %s1062_s14  ;;  %v901_v21 = vld [vmem:[%s1897_s0 + $0x4] ss:$24 sm:$0xf0]   ;;  %v908_v24 = vld [vmem:[%s1897_s0 - $0x51] ss:$24 sm:$0xf0]  }
  0x1e   :  { %v330_v25 = vsel %vm4_vm1, %v901_v21, %v900_v20  ;;  %s1064_s8 = smov 92   ;;  %v358_v26 = vsel %vm4_vm1, %v908_v24, %v907_v23  ;;  %v905_v27 = vld [vmem:[%s1897_s0 + $0x184] ss:$24 sm:$0xf]   ;;  %s1065_s11 = smov 89   ;;  %vm38_vm6 = vcmask 162816  }
  0x1f   :  { %v911_v28 = vld [vmem:[%s1897_s0 + $0x6f] ss:$24 sm:$0xf]   ;;  %v920_v31 = vld [vmem:[%s1897_s0 + $0xc9] ss:$24 sm:$0xf]  }
  0x20   :  { %v912_v29 = vld [vmem:[%s1897_s0 + $0x6f] ss:$24 sm:$0xf0]   ;;  %v921_v32 = vld [vmem:[%s1897_s0 + $0xc9] ss:$24 sm:$0xf0]  }
  0x21   :  { %271 = vrot.lane.b32.xlu0 %v270_v11, %s1062_s14  ;;  %300 = vrot.lane.b32.xlu1 %v299_v12, %s1063_s18  ;;  %v915_v30 = vld [vmem:[%s1897_s0 + $0x12f] ss:$24 sm:$0xf]   ;;  %v371_v33 = vsel %vm4_vm1, %v912_v29, %v911_v28  ;;  %v917_v34 = vld [vmem:[%s1897_s0 + $0x9] ss:$24 sm:$0xf]   ;;  %v402_v36 = vsel %vm4_vm1, %v921_v32, %v920_v31 }
  0x22   :  { %v918_v35 = vld [vmem:[%s1897_s0 + $0x9] ss:$24 sm:$0xf0]   ;;  %v925_v37 = vld [vmem:[%s1897_s0 + $0xd4] ss:$24 sm:$0xf]  }
  0x23   :  { %v926_v38 = vld [vmem:[%s1897_s0 + $0xd4] ss:$24 sm:$0xf0]   ;;  %v391_v39 = vsel %vm4_vm1, %v918_v35, %v917_v34  ;;  %s1066_s30 = smov 79   ;;  %s1067_s4 = smov 76   ;;  %vm43_vm7 = vcmask 1048552  }
  0x24   :  { %v420_v40 = vsel %vm4_vm1, %v926_v38, %v925_v37  ;;  %v923_v41 = vld [vmem:[%s1897_s0 + $0x189] ss:$24 sm:$0xf]   ;;  %v928_v42 = vld [vmem:[%s1897_s0 + $0x194] ss:$24 sm:$0xf]  }
  0x25   :  { %289 = vrot.lane.b32.xlu0 %v889_v13, %s1062_s14  ;;  %320 = vrot.lane.b32.xlu1 %v898_v16, %s1063_s18  ;;  %v929_v43 = vld [vmem:[%s1897_s0 - $0x4c] ss:$24 sm:$0xf0]   ;;  %v936_v45 = vld [vmem:[%s1897_s0 + $0xc3] ss:$24 sm:$0xf]  }
  0x26   :  { %v932_v44 = vld [vmem:[%s1897_s0 + $0x74] ss:$24 sm:$0xf]   ;;  %v937_v46 = vld [vmem:[%s1897_s0 + $0xc3] ss:$24 sm:$0xf0]   ;;  %v431_v47 = vsel %vm4_vm1, %v929_v43, %v928_v42 }
  0x27   :  { %v934_v48 = vld [vmem:[%s1897_s0 + $0x3] ss:$24 sm:$0xf]   ;;  %v461_v50 = vsel %vm4_vm1, %v937_v46, %v936_v45  ;;  %v941_v51 = vld [vmem:[%s1897_s0 + $0x18e] ss:$24 sm:$0xf]  }
  0x28   :  { %v935_v49 = vld [vmem:[%s1897_s0 + $0x3] ss:$24 sm:$0xf0]   ;;  %v942_v52 = vld [vmem:[%s1897_s0 - $0x52] ss:$24 sm:$0xf0]  }
  0x29   :  { %311 = vrot.lane.b32.xlu0 %v310_v19, %s1063_s18  ;;  %341 = vrot.lane.b32.xlu1 %v340_v22, %s1064_s8  ;;  %v451_v53 = vsel %vm4_vm1, %v935_v49, %v934_v48  ;;  %s1068_s23 = smov 69   ;;  %v479_v54 = vsel %vm4_vm1, %v942_v52, %v941_v51  ;;  %v939_v55 = vld [vmem:[%s1897_s0 + $0x183] ss:$24 sm:$0xf]   ;;  %s1069_s3 = smov 66   ;;  %vm100_vm8 = vcmask 138240  }
  0x2a   :  { %v949_v56 = vld [vmem:[%s1897_s0 + $0x12e] ss:$24 sm:$0xf]   ;;  %v954_v59 = vld [vmem:[%s1897_s0 + $0xc8] ss:$24 sm:$0xf]  }
  0x2b   :  { %v945_v57 = vld [vmem:[%s1897_s0 + $0x6e] ss:$24 sm:$0xf]   ;;  %v955_v60 = vld [vmem:[%s1897_s0 + $0xc8] ss:$24 sm:$0xf0]  }
  0x2c   :  { %v946_v58 = vld [vmem:[%s1897_s0 + $0x6e] ss:$24 sm:$0xf0]   ;;  %v809_v61 = vld [vmem:[%s1897_s0 + $0xc0] ss:$24 sm:$0xf]   ;;  %v523_v6 = vsel %vm4_vm1, %v955_v60, %v954_v59 }
  0x2d   :  { %331 = vrot.lane.b32.xlu0 %v330_v25, %s1064_s8  ;;  %359 = vrot.lane.b32.xlu1 %v358_v26, %s1065_s11  ;;  %v810_v62 = vld [vmem:[%s1897_s0 + $0xc0] ss:$24 sm:$0xf0]   ;;  %v492_v0 = vsel %vm4_vm1, %v946_v58, %v945_v57  ;;  %v959_v8 = vld [vmem:[%s1897_s0 + $0xd3] ss:$24 sm:$0xf]  }
  0x2e   :  { %v2_v63 = vld [vmem:[%s1897_s0] ss:$24 sm:$0xf]   ;;  %v13_v1 = vsel %vm4_vm1, %v810_v62, %v809_v61  ;;  %v960_v9 = vld [vmem:[%s1897_s0 + $0xd3] ss:$24 sm:$0xf0]  }
  0x2f   :  { %v3_v2 = vld [vmem:[%s1897_s0] ss:$24 sm:$0xf0]   ;;  %811 = vst.msk [vmem:[%s1898_s1 + $0x28] sm:$0xff] %vm6_vm5, %v13_v1   ;;  %v541_v11 = vsel %vm4_vm1, %v960_v9, %v959_v8  ;;  %s1071_s6 = smov 53   ;;  %s1072_s25 = smov 46  }
  0x30   :  { %v951_v3 = vld [vmem:[%s1897_s0 + $0x8] ss:$24 sm:$0xf]   ;;  %v5_v5 = vsel %vm4_vm1, %v3_v2, %v2_v63  ;;  %v962_v13 = vld [vmem:[%s1897_s0 + $0x193] ss:$24 sm:$0xf]  }
  0x31   :  { %348 = vrot.lane.b32.xlu0 %v905_v27, %s1064_s8  ;;  %381 = vrot.lane.b32.xlu1 %v915_v30, %s1065_s11  ;;  %v952_v4 = vld [vmem:[%s1897_s0 + $0x8] ss:$24 sm:$0xf0]   ;;  %7 = vst.msk [vmem:[%s1898_s1] sm:$0xff] %vm6_vm5, %v5_v5   ;;  %s1073_s28 = smov 43   ;;  %s1074_s18 = smov 33  }
  0x32   :  { %v812_v7 = vld [vmem:[%s1897_s0 + $0x180] ss:$24 sm:$0xf]   ;;  %v512_v10 = vsel %vm4_vm1, %v952_v4, %v951_v3  ;;  %v963_v14 = vld [vmem:[%s1897_s0 - $0x4d] ss:$24 sm:$0xf0]  }
  0x33   :  { %813 = vst.msk [vmem:[%s1898_s1 + $0x50] sm:$0xf] %vm6_vm5, %v812_v7   ;;  %v957_v12 = vld [vmem:[%s1897_s0 + $0x188] ss:$24 sm:$0xf]   ;;  %v552_v18 = vsel %vm4_vm1, %v963_v14, %v962_v13  ;;  %s1075_s21 = smov 30  }
  0x34   :  { %v966_v15 = vld [vmem:[%s1897_s0 + $0x73] ss:$24 sm:$0xf]   ;;  %v970_v16 = vld [vmem:[%s1897_s0 + $0xc2] ss:$24 sm:$0xf]  }
  0x35   :  { %372 = vrot.lane.b32.xlu0 %v371_v33, %s1065_s11  ;;  %403 = vrot.lane.b32.xlu1 %v402_v36, %s1066_s30  ;;  %v971_v17 = vld [vmem:[%s1897_s0 + $0xc2] ss:$24 sm:$0xf0]   ;;  %v975_v22 = vld [vmem:[%s1897_s0 + $0x18d] ss:$24 sm:$0xf]  }
  0x36   :  { %v968_v19 = vld [vmem:[%s1897_s0 + $0x2] ss:$24 sm:$0xf]   ;;  %v582_v21 = vsel %vm4_vm1, %v971_v17, %v970_v16  ;;  %v976_v23 = vld [vmem:[%s1897_s0 - $0x53] ss:$24 sm:$0xf0]  }
  0x37   :  { %v969_v20 = vld [vmem:[%s1897_s0 + $0x2] ss:$24 sm:$0xf0]   ;;  %v600_v25 = vsel %vm4_vm1, %v976_v23, %v975_v22  ;;  %v979_v27 = vld [vmem:[%s1897_s0 + $0x6d] ss:$24 sm:$0xf]  }
  0x38   :  { %v572_v24 = vsel %vm4_vm1, %v969_v20, %v968_v19  ;;  %v973_v26 = vld [vmem:[%s1897_s0 + $0x182] ss:$24 sm:$0xf]   ;;  %v980_v28 = vld [vmem:[%s1897_s0 + $0x6d] ss:$24 sm:$0xf0]  }
  0x39   :  { %392 = vrot.lane.b32.xlu0 %v391_v39, %s1066_s30  ;;  %421 = vrot.lane.b32.xlu1 %v420_v40, %s1067_s4  ;;  %v983_v29 = vld [vmem:[%s1897_s0 + $0x12d] ss:$24 sm:$0xf]   ;;  %v988_v30 = vld [vmem:[%s1897_s0 + $0xc7] ss:$24 sm:$0xf]   ;;  %v613_v32 = vsel %vm4_vm1, %v980_v28, %v979_v27 }
  0x3a   :  { %v989_v31 = vld [vmem:[%s1897_s0 + $0xc7] ss:$24 sm:$0xf0]   ;;  %v993_v36 = vld [vmem:[%s1897_s0 + $0xd2] ss:$24 sm:$0xf]  }
  0x3b   :  { %v985_v33 = vld [vmem:[%s1897_s0 + $0x7] ss:$24 sm:$0xf]   ;;  %v644_v35 = vsel %vm4_vm1, %v989_v31, %v988_v30  ;;  %v994_v37 = vld [vmem:[%s1897_s0 + $0xd2] ss:$24 sm:$0xf0]  }
  0x3c   :  { %v986_v34 = vld [vmem:[%s1897_s0 + $0x7] ss:$24 sm:$0xf0]   ;;  %v662_v39 = vsel %vm4_vm1, %v994_v37, %v993_v36  ;;  %v997_v42 = vld [vmem:[%s1897_s0 - $0x4e] ss:$24 sm:$0xf0]  }
  0x3d   :  { %410 = vrot.lane.b32.xlu0 %v923_v41, %s1066_s30  ;;  %441 = vrot.lane.b32.xlu1 %v932_v44, %s1067_s4  ;;  %v633_v38 = vsel %vm4_vm1, %v986_v34, %v985_v33  ;;  %v991_v40 = vld [vmem:[%s1897_s0 + $0x187] ss:$24 sm:$0xf]   ;;  %v996_v41 = vld [vmem:[%s1897_s0 + $0x192] ss:$24 sm:$0xf]  }
  0x3e   :  { %v1000_v43 = vld [vmem:[%s1897_s0 + $0x72] ss:$24 sm:$0xf]   ;;  %v1004_v44 = vld [vmem:[%s1897_s0 + $0xc1] ss:$24 sm:$0xf]   ;;  %v673_v46 = vsel %vm4_vm1, %v997_v42, %v996_v41 }
  0x3f   :  { %v1005_v45 = vld [vmem:[%s1897_s0 + $0xc1] ss:$24 sm:$0xf0]   ;;  %v1010_v51 = vld [vmem:[%s1897_s0 - $0x54] ss:$24 sm:$0xf0]  }
  0x40   :  { %v1003_v48 = vld [vmem:[%s1897_s0 + $0x1] ss:$24 sm:$0xf0]   ;;  %v703_v49 = vsel %vm4_vm1, %v1005_v45, %v1004_v44  ;;  %s1076_s11 = smov 23   ;;  %s1077_s15 = smov 20   ;;  %vm103_vm9 = vcmask 1048528  }
  0x41   :  { %432 = vrot.lane.b32.xlu0 %v431_v47, %s1067_s4  ;;  %462 = vrot.lane.b32.xlu1 %v461_v50, %s1068_s23  ;;  %v1002_v47 = vld [vmem:[%s1897_s0 + $0x1] ss:$24 sm:$0xf]   ;;  %v1009_v50 = vld [vmem:[%s1897_s0 + $0x18c] ss:$24 sm:$0xf]  }
  0x42   :  { %v693_v52 = vsel %vm4_vm1, %v1003_v48, %v1002_v47  ;;  %v1017_v58 = vld [vmem:[%s1897_s0 + $0x12c] ss:$24 sm:$0xf]   ;;  %v1022_v59 = vld [vmem:[%s1897_s0 + $0xc6] ss:$24 sm:$0xf]  }
  0x43   :  { %v1023_v60 = vld [vmem:[%s1897_s0 + $0xc6] ss:$24 sm:$0xf0]   ;;  %v1027_v3 = vld [vmem:[%s1897_s0 + $0xd1] ss:$24 sm:$0xf]  }
  0x44   :  { %v1019_v63 = vld [vmem:[%s1897_s0 + $0x6] ss:$24 sm:$0xf]   ;;  %v765_v1 = vsel %vm4_vm1, %v1023_v60, %v1022_v59  ;;  %v1028_v4 = vld [vmem:[%s1897_s0 + $0xd1] ss:$24 sm:$0xf0]  }
  0x45   :  { %452 = vrot.lane.b32.xlu0 %v451_v53, %s1068_s23  ;;  %480 = vrot.lane.b32.xlu1 %v479_v54, %s1069_s3  ;;  %v721_v53 = vsel %vm4_vm1, %v1010_v51, %v1009_v50  ;;  %v1007_v54 = vld [vmem:[%s1897_s0 + $0x181] ss:$24 sm:$0xf]   ;;  %v783_v7 = vsel %vm4_vm1, %v1028_v4, %v1027_v3  ;;  %v1025_v9 = vld [vmem:[%s1897_s0 + $0x186] ss:$24 sm:$0xf]  }
  0x46   :  { %vm160_vm10 = vcmask 80896   ;;  %vm163_vm11 = vcmask 1048472   ;;  %s1079_s2 = smov 7   ;;  %v1034_v13 = vld [vmem:[%s1897_s0 + $0x71] ss:$24 sm:$0xf]  }
  0x47   :  { %vm217_vm12 = vcmask 56320   ;;  %vm220_vm13 = vcmask 1048448   ;;  %vm273_vm14 = vcmask 1023792   ;;  %vm302_vm15 = vcmask 999192  }
  0x48   :  { %vm333_vm0 = vcmask 941792   ;;  %vm394_vm2 = vcmask 835192   ;;  %vm423_vm3 = vcmask 810592   ;;  %vm454_vm4 = vcmask 753192  }
  0x49   :  { %469 = vrot.lane.b32.xlu0 %v939_v55, %s1068_s23  ;;  %502 = vrot.lane.b32.xlu1 %v949_v56, %s1069_s3  ;;  %v1013_v55 = vld [vmem:[%s1897_s0 + $0x6c] ss:$24 sm:$0xf]   ;;  %vm482_vm5 = vcmask 728592  }
  0x4a   :  { %v1014_v56 = vld [vmem:[%s1897_s0 + $0x6c] ss:$24 sm:$0xf0]  }
  0x4b   :  { %v734_v61 = vsel %vm4_vm1, %v1014_v56, %v1013_v55 }
  0x4d   :  { %493 = vrot.lane.b32.xlu0 %v492_v0, %s1069_s3  ;;  %s1070_s3 = smov 56   ;;  %v1020_v0 = vld [vmem:[%s1897_s0 + $0x6] ss:$24 sm:$0xf0]  }
  0x4e   :  { %524 = vrot.lane.b32.xlu1 %v523_v6, %s1070_s3  ;;  %v754_v5 = vsel %vm4_vm1, %v1020_v0, %v1019_v63 }
  0x51   :  { %513 = vrot.lane.b32.xlu0 %v512_v10, %s1070_s3 }
  0x52   :  { %542 = vrot.lane.b32.xlu1 %v541_v11, %s1071_s6  ;;  %v1030_v11 = vld [vmem:[%s1897_s0 + $0x191] ss:$24 sm:$0xf]  }
  0x55   :  { %531 = vrot.lane.b32.xlu0 %v957_v12, %s1070_s3  ;;  %v1031_v12 = vld [vmem:[%s1897_s0 - $0x4f] ss:$24 sm:$0xf0]  }
  0x56   :  { %562 = vrot.lane.b32.xlu1 %v966_v15, %s1071_s6  ;;  %v794_v15 = vsel %vm4_vm1, %v1031_v12, %v1030_v11  ;;  %vm361_vm1 = vcmask 917192  }
  0x59   :  { %553 = vrot.lane.b32.xlu0 %v552_v18, %s1071_s6 }
  0x5a   :  { %583 = vrot.lane.b32.xlu1 %v582_v21, %s1072_s25 }
  0x5d   :  { %573 = vrot.lane.b32.xlu0 %v572_v24, %s1072_s25 }
  0x5e   :  { %601 = vrot.lane.b32.xlu1 %v600_v25, %s1073_s28 }
  0x61   :  { %590 = vrot.lane.b32.xlu0 %v973_v26, %s1072_s25 }
  0x62   :  { %623 = vrot.lane.b32.xlu1 %v983_v29, %s1073_s28 }
  0x65   :  { %614 = vrot.lane.b32.xlu0 %v613_v32, %s1073_s28 }
  0x66   :  { %645 = vrot.lane.b32.xlu1 %v644_v35, %s1074_s18 }
  0x69   :  { %634 = vrot.lane.b32.xlu0 %v633_v38, %s1074_s18 }
  0x6a   :  { %663 = vrot.lane.b32.xlu1 %v662_v39, %s1075_s21 }
  0x6d   :  { %652 = vrot.lane.b32.xlu0 %v991_v40, %s1074_s18  ;;  %s1078_s18 = smov 10  }
  0x6e   :  { %683 = vrot.lane.b32.xlu1 %v1000_v43, %s1075_s21 }
  0x71   :  { %674 = vrot.lane.b32.xlu0 %v673_v46, %s1075_s21 }
  0x72   :  { %704 = vrot.lane.b32.xlu1 %v703_v49, %s1076_s11 }
  0x75   :  { %694 = vrot.lane.b32.xlu0 %v693_v52, %s1076_s11 }
  0x76   :  { %722 = vrot.lane.b32.xlu1 %v721_v53, %s1077_s15  ;;  %v77_v57 = vpop.permute.xlu1 %76  }
  0x77   :  { %830 = vst.msk [vmem:[%s1898_s1 + $0x3c] sm:$0xf] %vm38_vm6, %v77_v57  }
  0x78   :  { %831 = vst.msk [vmem:[%s1898_s1 + $0x58] sm:$0xf] %vm43_vm7, %v77_v57  }
  0x79   :  { %711 = vrot.lane.b32.xlu0 %v1007_v54, %s1076_s11 }
  0x7a   :  { %744 = vrot.lane.b32.xlu1 %v1017_v58, %s1077_s15  ;;  %v99_v2 = vpop.permute.xlu1 %98  }
  0x7b   :  { %v37_v62 = vpop.permute.xlu0 %36   ;;  %836 = vst.msk [vmem:[%s1898_s1 + $0x20] sm:$0xff] %vm100_vm8, %v99_v2  }
  0x7c   :  { %818 = vst.msk [vmem:[%s1898_s1 + $0x60] sm:$0xf] %vm38_vm6, %v37_v62   ;;  %819 = vst.msk [vmem:[%s1898_s1 + $0xc] sm:$0xf0] %vm38_vm6, %v37_v62  }
  0x7d   :  { %820 = vst.msk [vmem:[%s1898_s1 + $0x8] sm:$0xff] %vm43_vm7, %v37_v62   ;;  %735 = vrot.lane.b32.xlu0 %v734_v61, %s1077_s15 }
  0x7e   :  { %837 = vst.msk [vmem:[%s1898_s1 + $0x40] sm:$0xff] %vm103_vm9, %v99_v2   ;;  %766 = vrot.lane.b32.xlu1 %v765_v1, %s1078_s18  ;;  %v137_v8 = vpop.permute.xlu1 %136  }
  0x7f   :  { %v61_v6 = vpop.permute.xlu0 %60   ;;  %847 = vst.msk [vmem:[%s1898_s1 + $0x70] sm:$0xf] %vm100_vm8, %v137_v8  }
  0x80   :  { %825 = vst.msk [vmem:[%s1898_s1 + $0x14] sm:$0xf] %vm38_vm6, %v61_v6   ;;  %826 = vst.msk [vmem:[%s1898_s1 + $0x34] sm:$0xf0] %vm38_vm6, %v61_v6   ;;  %vm515_vm6 = vcmask 646592  }
  0x81   :  { %827 = vst.msk [vmem:[%s1898_s1 + $0x30] sm:$0xff] %vm43_vm7, %v61_v6   ;;  %755 = vrot.lane.b32.xlu0 %v754_v5, %s1078_s18  ;;  %vm544_vm7 = vcmask 621992  }
  0x82   :  { %848 = vst.msk [vmem:[%s1898_s1 + $0x1c] sm:$0xf] %vm103_vm9, %v137_v8   ;;  %784 = vrot.lane.b32.xlu1 %v783_v7, %s1079_s2 }
  0x83   :  { %v121_v10 = vpop.permute.xlu0 %120   ;;  %v180_v14 = vpop.permute.xlu1 %179  }
  0x84   :  { %842 = vst.msk [vmem:[%s1898_s1 + $0x48] sm:$0xff] %vm100_vm8, %v121_v10   ;;  %vm575_vm8 = vcmask 564592  }
  0x85   :  { %843 = vst.msk [vmem:[%s1898_s1 + $0x68] sm:$0xf] %vm103_vm9, %v121_v10   ;;  %844 = vst.msk [vmem:[%s1898_s1 + $0x14] sm:$0xf0] %vm103_vm9, %v121_v10   ;;  %773 = vrot.lane.b32.xlu0 %v1025_v9, %s1078_s18  ;;  %vm603_vm9 = vcmask 539992  }
  0x86   :  { %858 = vst.msk [vmem:[%s1898_s1 + $0x30] sm:$0xff] %vm160_vm10, %v180_v14   ;;  %804 = vrot.lane.b32.xlu1 %v1034_v13, %s1079_s2 }
  0x87   :  { %859 = vst.msk [vmem:[%s1898_s1 + $0x28] sm:$0xff] %vm163_vm11, %v180_v14   ;;  %v159_v16 = vpop.permute.xlu0 %158   ;;  %v216_v17 = vpop.permute.xlu1 %215  }
  0x88   :  { %853 = vst.msk [vmem:[%s1898_s1 + $0x8] sm:$0xff] %vm160_vm10, %v159_v16  }
  0x89   :  { %164 = vst.msk [vmem:[%s1898_s1] sm:$0xff] %vm163_vm11, %v159_v16   ;;  %795 = vrot.lane.b32.xlu0 %v794_v15, %s1079_s2 }
  0x8a   :  { %868 = vst.msk [vmem:[%s1898_s1 + $0x40] sm:$0xff] %vm217_vm12, %v216_v17  }
  0x8b   :  { %869 = vst.msk [vmem:[%s1898_s1 + $0x60] sm:$0xf] %vm220_vm13, %v216_v17   ;;  %870 = vst.msk [vmem:[%s1898_s1 + $0xc] sm:$0xf0] %vm220_vm13, %v216_v17   ;;  %v194_v18 = vpop.permute.xlu0 %193   ;;  %v258_v19 = vpop.permute.xlu1 %257  }
  0x8c   :  { %862 = vst.msk [vmem:[%s1898_s1 + $0x58] sm:$0xf] %vm160_vm10, %v194_v18   ;;  %vm636_vm10 = vcmask 457992  }
  0x8d   :  { %863 = vst.msk [vmem:[%s1898_s1 + $0x50] sm:$0xf] %vm163_vm11, %v194_v18   ;;  %vm665_vm11 = vcmask 433392  }
  0x8e   :  { %881 = vst.msk [vmem:[%s1898_s1 + $0x1c] sm:$0xf] %vm217_vm12, %v258_v19  }
  0x8f   :  { %882 = vst.msk [vmem:[%s1898_s1 + $0x3c] sm:$0xf] %vm220_vm13, %v258_v19   ;;  %v240_v20 = vpop.permute.xlu0 %239   ;;  %v283_v21 = vpop.permute.xlu1 %282  }
  0x90   :  { %875 = vst.msk [vmem:[%s1898_s1 + $0x68] sm:$0xf] %vm217_vm12, %v240_v20   ;;  %876 = vst.msk [vmem:[%s1898_s1 + $0x14] sm:$0xf0] %vm217_vm12, %v240_v20   ;;  %vm696_vm12 = vcmask 375992  }
  0x91   :  { %877 = vst.msk [vmem:[%s1898_s1 + $0x14] sm:$0xf] %vm220_vm13, %v240_v20   ;;  %878 = vst.msk [vmem:[%s1898_s1 + $0x34] sm:$0xf0] %vm220_vm13, %v240_v20   ;;  %vm724_vm13 = vcmask 351392  }
  0x92   :  { %888 = vst.msk [vmem:[%s1898_s1 + $0x30] sm:$0xff] %vm273_vm14, %v283_v21  }
  0x93   :  { %v272_v22 = vpop.permute.xlu0 %271   ;;  %v301_v23 = vpop.permute.xlu1 %300  }
  0x94   :  { %885 = vst.msk [vmem:[%s1898_s1 + $0x8] sm:$0xff] %vm273_vm14, %v272_v22  }
  0x95   :  { %893 = vst.msk [vmem:[%s1898_s1 + $0x40] sm:$0xff] %vm302_vm15, %v301_v23  }
  0x97   :  { %v290_v24 = vpop.permute.xlu0 %289   ;;  %v321_v25 = vpop.permute.xlu1 %320  }
  0x98   :  { %890 = vst.msk [vmem:[%s1898_s1 + $0x58] sm:$0xf] %vm273_vm14, %v290_v24   ;;  %vm757_vm14 = vcmask 269392  }
  0x99   :  { %899 = vst.msk [vmem:[%s1898_s1 + $0x1c] sm:$0xf] %vm302_vm15, %v321_v25  }
  0x9b   :  { %v312_v26 = vpop.permute.xlu0 %311   ;;  %v342_v27 = vpop.permute.xlu1 %341  }
  0x9c   :  { %896 = vst.msk [vmem:[%s1898_s1 + $0x68] sm:$0xf] %vm302_vm15, %v312_v26   ;;  %897 = vst.msk [vmem:[%s1898_s1 + $0x14] sm:$0xf0] %vm302_vm15, %v312_v26   ;;  %vm786_vm15 = vcmask 244792  }
  0x9d   :  { %904 = vst.msk [vmem:[%s1898_s1 + $0x28] sm:$0xff] %vm333_vm0, %v342_v27  }
  0x9f   :  { %v332_v28 = vpop.permute.xlu0 %331   ;;  %v360_v29 = vpop.permute.xlu1 %359  }
  0xa0   :  { %334 = vst.msk [vmem:[%s1898_s1] sm:$0xff] %vm333_vm0, %v332_v28  }
  0xa1   :  { %909 = vst.msk [vmem:[%s1898_s1 + $0x60] sm:$0xf] %vm361_vm1, %v360_v29   ;;  %910 = vst.msk [vmem:[%s1898_s1 + $0xc] sm:$0xf0] %vm361_vm1, %v360_v29  }
  0xa3   :  { %v349_v30 = vpop.permute.xlu0 %348   ;;  %v382_v31 = vpop.permute.xlu1 %381  }
  0xa4   :  { %906 = vst.msk [vmem:[%s1898_s1 + $0x50] sm:$0xf] %vm333_vm0, %v349_v30  }
  0xa5   :  { %916 = vst.msk [vmem:[%s1898_s1 + $0x3c] sm:$0xf] %vm361_vm1, %v382_v31  }
  0xa7   :  { %v373_v32 = vpop.permute.xlu0 %372   ;;  %v404_v33 = vpop.permute.xlu1 %403  }
  0xa8   :  { %913 = vst.msk [vmem:[%s1898_s1 + $0x14] sm:$0xf] %vm361_vm1, %v373_v32   ;;  %914 = vst.msk [vmem:[%s1898_s1 + $0x34] sm:$0xf0] %vm361_vm1, %v373_v32  }
  0xa9   :  { %922 = vst.msk [vmem:[%s1898_s1 + $0x30] sm:$0xff] %vm394_vm2, %v404_v33  }
  0xab   :  { %v393_v34 = vpop.permute.xlu0 %392   ;;  %v422_v35 = vpop.permute.xlu1 %421  }
  0xac   :  { %919 = vst.msk [vmem:[%s1898_s1 + $0x8] sm:$0xff] %vm394_vm2, %v393_v34  }
  0xad   :  { %927 = vst.msk [vmem:[%s1898_s1 + $0x40] sm:$0xff] %vm423_vm3, %v422_v35  }
  0xaf   :  { %v411_v36 = vpop.permute.xlu0 %410   ;;  %v442_v37 = vpop.permute.xlu1 %441  }
  0xb0   :  { %924 = vst.msk [vmem:[%s1898_s1 + $0x58] sm:$0xf] %vm394_vm2, %v411_v36  }
  0xb1   :  { %933 = vst.msk [vmem:[%s1898_s1 + $0x1c] sm:$0xf] %vm423_vm3, %v442_v37  }
  0xb3   :  { %v433_v38 = vpop.permute.xlu0 %432   ;;  %v463_v39 = vpop.permute.xlu1 %462  }
  0xb4   :  { %930 = vst.msk [vmem:[%s1898_s1 + $0x68] sm:$0xf] %vm423_vm3, %v433_v38   ;;  %931 = vst.msk [vmem:[%s1898_s1 + $0x14] sm:$0xf0] %vm423_vm3, %v433_v38  }
  0xb5   :  { %938 = vst.msk [vmem:[%s1898_s1 + $0x28] sm:$0xff] %vm454_vm4, %v463_v39  }
  0xb7   :  { %v453_v40 = vpop.permute.xlu0 %452   ;;  %v481_v41 = vpop.permute.xlu1 %480  }
  0xb8   :  { %455 = vst.msk [vmem:[%s1898_s1] sm:$0xff] %vm454_vm4, %v453_v40  }
  0xb9   :  { %943 = vst.msk [vmem:[%s1898_s1 + $0x60] sm:$0xf] %vm482_vm5, %v481_v41   ;;  %944 = vst.msk [vmem:[%s1898_s1 + $0xc] sm:$0xf0] %vm482_vm5, %v481_v41  }
  0xbb   :  { %v470_v42 = vpop.permute.xlu0 %469   ;;  %v503_v43 = vpop.permute.xlu1 %502  }
  0xbc   :  { %940 = vst.msk [vmem:[%s1898_s1 + $0x50] sm:$0xf] %vm454_vm4, %v470_v42  }
  0xbd   :  { %950 = vst.msk [vmem:[%s1898_s1 + $0x3c] sm:$0xf] %vm482_vm5, %v503_v43  }
  0xbf   :  { %v494_v44 = vpop.permute.xlu0 %493  }
  0xc0   :  { %947 = vst.msk [vmem:[%s1898_s1 + $0x14] sm:$0xf] %vm482_vm5, %v494_v44   ;;  %948 = vst.msk [vmem:[%s1898_s1 + $0x34] sm:$0xf0] %vm482_vm5, %v494_v44   ;;  %v525_v45 = vpop.permute.xlu1 %524  }
  0xc1   :  { %956 = vst.msk [vmem:[%s1898_s1 + $0x30] sm:$0xff] %vm515_vm6, %v525_v45  }
  0xc3   :  { %v514_v46 = vpop.permute.xlu0 %513  }
  0xc4   :  { %953 = vst.msk [vmem:[%s1898_s1 + $0x8] sm:$0xff] %vm515_vm6, %v514_v46   ;;  %v543_v47 = vpop.permute.xlu1 %542  }
  0xc5   :  { %961 = vst.msk [vmem:[%s1898_s1 + $0x40] sm:$0xff] %vm544_vm7, %v543_v47  }
  0xc7   :  { %v532_v48 = vpop.permute.xlu0 %531  }
  0xc8   :  { %958 = vst.msk [vmem:[%s1898_s1 + $0x58] sm:$0xf] %vm515_vm6, %v532_v48   ;;  %v563_v49 = vpop.permute.xlu1 %562  }
  0xc9   :  { %967 = vst.msk [vmem:[%s1898_s1 + $0x1c] sm:$0xf] %vm544_vm7, %v563_v49  }
  0xcb   :  { %v554_v50 = vpop.permute.xlu0 %553  }
  0xcc   :  { %964 = vst.msk [vmem:[%s1898_s1 + $0x68] sm:$0xf] %vm544_vm7, %v554_v50   ;;  %965 = vst.msk [vmem:[%s1898_s1 + $0x14] sm:$0xf0] %vm544_vm7, %v554_v50   ;;  %v584_v51 = vpop.permute.xlu1 %583  }
  0xcd   :  { %972 = vst.msk [vmem:[%s1898_s1 + $0x28] sm:$0xff] %vm575_vm8, %v584_v51  }
  0xcf   :  { %v574_v52 = vpop.permute.xlu0 %573  }
  0xd0   :  { %576 = vst.msk [vmem:[%s1898_s1] sm:$0xff] %vm575_vm8, %v574_v52   ;;  %v602_v53 = vpop.permute.xlu1 %601  }
  0xd1   :  { %977 = vst.msk [vmem:[%s1898_s1 + $0x60] sm:$0xf] %vm603_vm9, %v602_v53   ;;  %978 = vst.msk [vmem:[%s1898_s1 + $0xc] sm:$0xf0] %vm603_vm9, %v602_v53  }
  0xd3   :  { %v591_v54 = vpop.permute.xlu0 %590  }
  0xd4   :  { %974 = vst.msk [vmem:[%s1898_s1 + $0x50] sm:$0xf] %vm575_vm8, %v591_v54   ;;  %v624_v55 = vpop.permute.xlu1 %623  }
  0xd5   :  { %984 = vst.msk [vmem:[%s1898_s1 + $0x3c] sm:$0xf] %vm603_vm9, %v624_v55  }
  0xd7   :  { %v615_v56 = vpop.permute.xlu0 %614  }
  0xd8   :  { %981 = vst.msk [vmem:[%s1898_s1 + $0x14] sm:$0xf] %vm603_vm9, %v615_v56   ;;  %982 = vst.msk [vmem:[%s1898_s1 + $0x34] sm:$0xf0] %vm603_vm9, %v615_v56   ;;  %v646_v57 = vpop.permute.xlu1 %645  }
  0xd9   :  { %990 = vst.msk [vmem:[%s1898_s1 + $0x30] sm:$0xff] %vm636_vm10, %v646_v57  }
  0xdb   :  { %v635_v58 = vpop.permute.xlu0 %634  }
  0xdc   :  { %987 = vst.msk [vmem:[%s1898_s1 + $0x8] sm:$0xff] %vm636_vm10, %v635_v58   ;;  %v664_v59 = vpop.permute.xlu1 %663  }
  0xdd   :  { %995 = vst.msk [vmem:[%s1898_s1 + $0x40] sm:$0xff] %vm665_vm11, %v664_v59  }
  0xdf   :  { %v653_v60 = vpop.permute.xlu0 %652  }
  0xe0   :  { %992 = vst.msk [vmem:[%s1898_s1 + $0x58] sm:$0xf] %vm636_vm10, %v653_v60   ;;  %v684_v61 = vpop.permute.xlu1 %683  }
  0xe1   :  { %1001 = vst.msk [vmem:[%s1898_s1 + $0x1c] sm:$0xf] %vm665_vm11, %v684_v61  }
  0xe3   :  { %v675_v62 = vpop.permute.xlu0 %674  }
  0xe4   :  { %998 = vst.msk [vmem:[%s1898_s1 + $0x68] sm:$0xf] %vm665_vm11, %v675_v62   ;;  %999 = vst.msk [vmem:[%s1898_s1 + $0x14] sm:$0xf0] %vm665_vm11, %v675_v62   ;;  %v705_v63 = vpop.permute.xlu1 %704  }
  0xe5   :  { %1006 = vst.msk [vmem:[%s1898_s1 + $0x28] sm:$0xff] %vm696_vm12, %v705_v63  }
  0xe7   :  { %v695_v0 = vpop.permute.xlu0 %694  }
  0xe8   :  { %697 = vst.msk [vmem:[%s1898_s1] sm:$0xff] %vm696_vm12, %v695_v0   ;;  %v723_v1 = vpop.permute.xlu1 %722  }
  0xe9   :  { %1011 = vst.msk [vmem:[%s1898_s1 + $0x60] sm:$0xf] %vm724_vm13, %v723_v1   ;;  %1012 = vst.msk [vmem:[%s1898_s1 + $0xc] sm:$0xf0] %vm724_vm13, %v723_v1  }
  0xeb   :  { %v712_v2 = vpop.permute.xlu0 %711  }
  0xec   :  { %1008 = vst.msk [vmem:[%s1898_s1 + $0x50] sm:$0xf] %vm696_vm12, %v712_v2   ;;  %v745_v3 = vpop.permute.xlu1 %744  }
  0xed   :  { %1018 = vst.msk [vmem:[%s1898_s1 + $0x3c] sm:$0xf] %vm724_vm13, %v745_v3  }
  0xef   :  { %v736_v4 = vpop.permute.xlu0 %735  }
  0xf0   :  { %1015 = vst.msk [vmem:[%s1898_s1 + $0x14] sm:$0xf] %vm724_vm13, %v736_v4   ;;  %1016 = vst.msk [vmem:[%s1898_s1 + $0x34] sm:$0xf0] %vm724_vm13, %v736_v4   ;;  %v767_v5 = vpop.permute.xlu1 %766  }
  0xf1   :  { %1024 = vst.msk [vmem:[%s1898_s1 + $0x30] sm:$0xff] %vm757_vm14, %v767_v5  }
  0xf3   :  { %v756_v6 = vpop.permute.xlu0 %755  }
  0xf4   :  { %1021 = vst.msk [vmem:[%s1898_s1 + $0x8] sm:$0xff] %vm757_vm14, %v756_v6   ;;  %v785_v7 = vpop.permute.xlu1 %784  }
  0xf5   :  { %1029 = vst.msk [vmem:[%s1898_s1 + $0x40] sm:$0xff] %vm786_vm15, %v785_v7  }
  0xf7   :  { %v774_v8 = vpop.permute.xlu0 %773  }
  0xf8   :  { %1026 = vst.msk [vmem:[%s1898_s1 + $0x58] sm:$0xf] %vm757_vm14, %v774_v8   ;;  %v805_v9 = vpop.permute.xlu1 %804  }
  0xf9   :  { %1035 = vst.msk [vmem:[%s1898_s1 + $0x1c] sm:$0xf] %vm786_vm15, %v805_v9  }
  0xfb   :  { %v796_v10 = vpop.permute.xlu0 %795  }
  0xfc   :  { %1032 = vst.msk [vmem:[%s1898_s1 + $0x68] sm:$0xf] %vm786_vm15, %v796_v10   ;;  %1033 = vst.msk [vmem:[%s1898_s1 + $0x14] sm:$0xf0] %vm786_vm15, %v796_v10  }

// kernel: res_gat_by_num.1
= control target key start
LH: loop header
LB: loop body
LE: loop exit
PB: predicated region body
PF: predicated region fallthrough
CT: control target
= control target key end

     0   :  { %7 = vsyncpa [#allocation3], 0  ;;  %s4828_s9 = smov 0   ;;  %s4992_s0 = inlined_call_operand.vmem [shape: f32[32,640], index: 0, kind: input, shape index: {}]   ;;  %s4993_s1 = inlined_call_operand.hbm [shape: bf16[2,640,640], index: 1, kind: input, shape index: {}]   ;;  %s4994_s2 = inlined_call_operand.vmem [shape: f32[32,640], index: 2, kind: output, shape index: {}]  }
   0x1 LB: > { %s3591_s10 = sadd.s32 4294967295, %s4805_s9   ;;  %p3593_p0 = scmp.ge.s32.totalorder %s4805_s9, 1  ;;  %s4805_s9 = sphi %s4828_s9, %s13_s9  }
   0x2   : > { %p91_p1 = scmp.lt.s32.totalorder %s4805_s9, 3  ;;  %s4807_s11 = smov [#allocation2]  }
   0x3   : > { %s103_s12 = sshll.u32 %s4807_s11, 4  ;;  %p4842_p3 = scmp.eq.s32.totalorder %s3591_s10, 0  ;;  %s104_s12 = int_to_ptr.vmem [resolvable:$true] %s103_s12 }
   0x4   : > { %p4836_p2 = pnand %p3593_p0, %p91_p1  ;;  %s4767_s18 = scalar_lea.hbm %s4993_s1, 51200 }
   0x5   : > { %s4999_s14 = scalar_select %p4842_p3, 1, 0 }
   0x6   : > { %s4998_s13 = scalar_select %p4836_p2, 1, 0 }
   0x7   : > { %p4187_p4 = pneg %p4836_p2  ;;  %p4768_p6 = scmp.ne.s32.totalorder %s4993_s1, %s4767_s18 }
   0x8   : > { %p4774_p10 = scmp.lt.u32.totalorder %s4767_s18, %s4993_s1 }
   0x9   : > { %p4850_p5 = pnand %p4842_p3, %p4187_p4 }
   0xb   : > { %p4769_p7 = pneg %p4850_p5 }
   0xd   : > { %p4770_p8 = pnand %p4769_p7, %p4768_p6 }
   0xf   : > { %p4771_p9 = pneg %p4770_p8 }
  0x11   : > { %p4776_p11 = pnand %p4774_p10, %p4771_p9 }
  0x13   : > { %4779 = shalt.err (!%p4776_p11)
}
  0x14   : > { %s4780_s23 = scalar_lea.vmem %s104_s12, 51200  ;;  %p4788_p1 = scmp.lt.s32.totalorder %s104_s12, %s104_s12 }
  0x15   : > { %p4781_p12 = scmp.ne.s32.totalorder %s104_s12, %s4780_s23  ;;  %p4789_p4 = scmp.lt.s32.totalorder %s4780_s23, %s4780_s23 }
  0x17   : > { %p4783_p13 = pnand %p4781_p12, %p4769_p7  ;;  %p4790_p3 = por %p4789_p4, %p4788_p1 }
  0x19   : > { %p4784_p0 = pneg %p4783_p13 }
  0x1b   : > { %p4791_p2 = pnand %p4790_p3, %p4784_p0 }
  0x1d   : > { %4794 = shalt.err (!%p4791_p2)
}
  0x1e   : > { %s4808_s24 = smov 320   ;;  %s4809_s25 = smov 20  }
  0x1f   : > { %4190 = dma.hbm_to_vmem [thread:$0]  (!%p4850_p5), %s4993_s1, 51200, %s104_s12, [#allocation3], %s4808_s24, %s4808_s24, %s4809_s25  }
  0x20   : > { %p5001_p6 = scmp.ne.s32.totalorder %s4998_s13, 0 }
  0x21   : > { %p5002_p8 = scmp.ne.s32.totalorder (!%p5001_p6), %s4999_s14, 0 }
  0x22   : > { %129 = sbr.rel (%p5001_p6) target bundleno = 798 (0x31e), region = 28 }
  0x29   : > { %4800 = dma.done.wait (%p5002_p8), [#allocation3], 51200  }
  0x2a   : > { %4802 = vsyncadd (%p5002_p8), [#allocation3], 4294916096  ;;  %v4207_v0 = vld [vmem:[#allocation2 + $0x4] ss:$20 sps:$4 sm:$0xff]   ;;  %v4209_v1 = vld [vmem:[#allocation2 + $0xc] ss:$20 sps:$4 sm:$0xff]  }
  0x2b   : > { %1463 = vmatprep.subr.bf16.mxu0 %v4207_v0  ;;  %v4211_v2 = vld [vmem:[#allocation2] ss:$20 sps:$4 sm:$0xff]   ;;  %v4212_v3 = vld [vmem:[#allocation2 + $0x8] ss:$20 sps:$4 sm:$0xff]   ;;  %1592 = vmatprep.subr.bf16.mxu1 %v4209_v1  ;;  %v4218_v7 = vld [vmem:[#allocation2 + $0x30] ss:$20 sps:$4 sm:$0xff]  }
  0x2c   : > { %v4213_v4 = vld [vmem:[#allocation2 + $0x2c] ss:$20 sps:$4 sm:$0xff]   ;;  %1464 = vmatpush1.bf16.msra.mxu0 %v4211_v2  ;;  %1593 = vmatpush1.bf16.msra.mxu1 %v4212_v3  ;;  %v4215_v5 = vld [vmem:[#allocation2 + $0x34] ss:$20 sps:$4 sm:$0xff]   ;;  %v4221_v9 = vld [vmem:[#allocation2 + $0x5c] ss:$20 sps:$4 sm:$0xff]  }
  0x2d   : > { %v4217_v6 = vld [vmem:[#allocation2 + $0x28] ss:$20 sps:$4 sm:$0xff]   ;;  %1465 = vmatprep.subr.bf16.mxu0 %v4213_v4  ;;  %1594 = vmatprep.subr.bf16.mxu1 %v4215_v5  ;;  %v4223_v10 = vld [vmem:[#allocation2 + $0x50] ss:$20 sps:$4 sm:$0xff]   ;;  %v4224_v11 = vld [vmem:[#allocation2 + $0x58] ss:$20 sps:$4 sm:$0xff]  }
  0x2e   : > { %v4219_v8 = vld [vmem:[#allocation2 + $0x54] ss:$20 sps:$4 sm:$0xff]   ;;  %v4225_v12 = vld [vmem:[#allocation2 + $0x7c] ss:$20 sps:$4 sm:$0xff]   ;;  %v4227_v13 = vld [vmem:[#allocation2 + $0x84] ss:$20 sps:$4 sm:$0xff]  }
  0x2f   : > { %v4229_v14 = vld [vmem:[#allocation2 + $0x78] ss:$20 sps:$4 sm:$0xff]   ;;  %v4230_v15 = vld [vmem:[#allocation2 + $0x80] ss:$20 sps:$4 sm:$0xff]   ;;  %v4236_v19 = vld [vmem:[#allocation2 + $0xa8] ss:$20 sps:$4 sm:$0xff]  }
  0x30   : > { %1466 = vmatpush1.bf16.msra.mxu0 %v4217_v6  ;;  %1595 = vmatpush1.bf16.msra.mxu1 %v4218_v7  ;;  %v4231_v16 = vld [vmem:[#allocation2 + $0xa4] ss:$20 sps:$4 sm:$0xff]   ;;  %v4233_v17 = vld [vmem:[#allocation2 + $0xac] ss:$20 sps:$4 sm:$0xff]   ;;  %v4239_v21 = vld [vmem:[#allocation2 + $0xd4] ss:$20 sps:$4 sm:$0xff]  }
  0x31   : > { %1467 = vmatprep.subr.bf16.mxu0 %v4219_v8  ;;  %1596 = vmatprep.subr.bf16.mxu1 %v4221_v9  ;;  %v4235_v18 = vld [vmem:[#allocation2 + $0xa0] ss:$20 sps:$4 sm:$0xff]   ;;  %v4241_v22 = vld [vmem:[#allocation2 + $0xc8] ss:$20 sps:$4 sm:$0xff]   ;;  %v4242_v23 = vld [vmem:[#allocation2 + $0xd0] ss:$20 sps:$4 sm:$0xff]  }
  0x32   : > { %v4237_v20 = vld [vmem:[#allocation2 + $0xcc] ss:$20 sps:$4 sm:$0xff]   ;;  %v4243_v24 = vld [vmem:[#allocation2 + $0xf4] ss:$20 sps:$4 sm:$0xff]   ;;  %v4245_v25 = vld [vmem:[#allocation2 + $0xfc] ss:$20 sps:$4 sm:$0xff]  }
  0x33   : > { %v4247_v26 = vld [vmem:[#allocation2 + $0xf0] ss:$20 sps:$4 sm:$0xff]   ;;  %v4248_v27 = vld [vmem:[#allocation2 + $0xf8] ss:$20 sps:$4 sm:$0xff]   ;;  %s3598_s28 = sshll.u32 %s3591_s10, 1  ;;  %vm4812_vm0 = vmmov 0  }
  0x34   : > { %1468 = vmatpush1.bf16.msra.mxu0 %v4223_v10  ;;  %1597 = vmatpush1.bf16.msra.mxu1 %v4224_v11  ;;  %v4249_v28 = vld [vmem:[#allocation2 + $0x11c] ss:$20 sps:$4 sm:$0xff]   ;;  %v4251_v29 = vld [vmem:[#allocation2 + $0x124] ss:$20 sps:$4 sm:$0xff]   ;;  %p154_p2 = scmp.lt.s32.totalorder %s3598_s28, 3 }
  0x35   : > { %1469 = vmatprep.subr.bf16.mxu0 %v4225_v12  ;;  %1598 = vmatprep.subr.bf16.mxu1 %v4227_v13  ;;  %v4253_v30 = vld [vmem:[#allocation2 + $0x118] ss:$20 sps:$4 sm:$0xff]   ;;  %v4254_v31 = vld [vmem:[#allocation2 + $0x120] ss:$20 sps:$4 sm:$0xff]   ;;  %v4260_v35 = vld [vmem:[#allocation2 + $0x148] ss:$20 sps:$4 sm:$0xff]  }
  0x36   : > { %v4255_v32 = vld [vmem:[#allocation2 + $0x144] ss:$20 sps:$4 sm:$0xff]   ;;  %v4257_v33 = vld [vmem:[#allocation2 + $0x14c] ss:$20 sps:$4 sm:$0xff]   ;;  %s5004_s28 = smov (!%p154_p2, %s3598_s28), 3 }
  0x37   : > { %v4259_v34 = vld [vmem:[#allocation2 + $0x140] ss:$20 sps:$4 sm:$0xff]   ;;  %v4265_v38 = vld [vmem:[#allocation2 + $0x168] ss:$20 sps:$4 sm:$0xff]   ;;  %s4182_s29 = smul.u32 40, %s5004_s28 }
  0x38   : > { %1470 = vmatpush1.bf16.msra.mxu0 %v4229_v14  ;;  %1599 = vmatpush1.bf16.msra.mxu1 %v4230_v15  ;;  %v4261_v36 = vld [vmem:[#allocation2 + $0x16c] ss:$20 sps:$4 sm:$0xff]   ;;  %v4263_v37 = vld [vmem:[#allocation2 + $0x174] ss:$20 sps:$4 sm:$0xff]   ;;  %v4266_v39 = vld [vmem:[#allocation2 + $0x170] ss:$20 sps:$4 sm:$0xff]  }
  0x39   : > { %1471 = vmatprep.subr.bf16.mxu0 %v4231_v16  ;;  %1600 = vmatprep.subr.bf16.mxu1 %v4233_v17  ;;  %v4267_v40 = vld [vmem:[#allocation2 + $0x194] ss:$20 sps:$4 sm:$0xff]   ;;  %v4269_v41 = vld [vmem:[#allocation2 + $0x19c] ss:$20 sps:$4 sm:$0xff]   ;;  %v4272_v43 = vld [vmem:[#allocation2 + $0x198] ss:$20 sps:$4 sm:$0xff]   ;;  %s4886_s4 = scalar_lea.vmem %s4992_s0, %s4182_s29  ;;  %s4977_s7 = scalar_lea.vmem %s4994_s2, %s4182_s29 }
  0x3a   : > { %v4271_v42 = vld [vmem:[#allocation2 + $0x190] ss:$20 sps:$4 sm:$0xff]   ;;  %v169_v46 = vld [vmem:[%s4886_s4 + $0x8] sm:$0xff]  ;;  %v4278_v49 = vld [vmem:[#allocation2 + $0x1c0] ss:$20 sps:$4 sm:$0xff]  }
  0x3b   : > { %v4273_v44 = vld [vmem:[#allocation2 + $0x1bc] ss:$20 sps:$4 sm:$0xff]   ;;  %v4275_v45 = vld [vmem:[#allocation2 + $0x1c4] ss:$20 sps:$4 sm:$0xff]   ;;  %v4281_v52 = vld [vmem:[#allocation2 + $0x1ec] ss:$20 sps:$4 sm:$0xff]  }
  0x3c   : > { %1472 = vmatpush1.bf16.msra.mxu0 %v4235_v18  ;;  %1601 = vmatpush1.bf16.msra.mxu1 %v4236_v19  ;;  %v174_v47 = vld [vmem:[%s4886_s4 + $0x30] sm:$0xff]  ;;  %v4277_v48 = vld [vmem:[#allocation2 + $0x1b8] ss:$20 sps:$4 sm:$0xff]   ;;  %v4284_v54 = vld [vmem:[#allocation2 + $0x1e8] ss:$20 sps:$4 sm:$0xff]  }
  0x3d   : > { %1473 = vmatprep.subr.bf16.mxu0 %v4237_v20  ;;  %1602 = vmatprep.subr.bf16.mxu1 %v4239_v21  ;;  %v4890_v50 = vpack.c.bf16 %v174_v47, %v169_v46  ;;  %v4279_v51 = vld [vmem:[#allocation2 + $0x1e4] ss:$20 sps:$4 sm:$0xff]   ;;  %v4283_v53 = vld [vmem:[#allocation2 + $0x1e0] ss:$20 sps:$4 sm:$0xff]   ;;  %v4289_v57 = vld [vmem:[#allocation2 + $0x208] ss:$20 sps:$4 sm:$0xff]  }
  0x3e   : > { %v4285_v55 = vld [vmem:[#allocation2 + $0x20c] ss:$20 sps:$4 sm:$0xff]   ;;  %v4287_v56 = vld [vmem:[#allocation2 + $0x214] ss:$20 sps:$4 sm:$0xff]   ;;  %v4290_v58 = vld [vmem:[#allocation2 + $0x210] ss:$20 sps:$4 sm:$0xff]  }
  0x3f   : > { %1495 = vmatprep.mubr.bf16.mxu0 %v4890_v50  ;;  %1624 = vmatprep.mubr.bf16.mxu1 %v4890_v50  ;;  %v4291_v59 = vld [vmem:[#allocation2 + $0x234] ss:$20 sps:$4 sm:$0xff]   ;;  %v4293_v60 = vld [vmem:[#allocation2 + $0x23c] ss:$20 sps:$4 sm:$0xff]   ;;  %v4296_v62 = vld [vmem:[#allocation2 + $0x238] ss:$20 sps:$4 sm:$0xff]  }
  0x40   : > { %1474 = vmatpush1.bf16.msra.mxu0 %v4241_v22  ;;  %1603 = vmatpush1.bf16.msra.mxu1 %v4242_v23  ;;  %v4295_v61 = vld [vmem:[#allocation2 + $0x230] ss:$20 sps:$4 sm:$0xff]   ;;  %v4301_v1 = vld [vmem:[#allocation2 + $0x258] ss:$20 sps:$4 sm:$0xff]   ;;  %v4302_v2 = vld [vmem:[#allocation2 + $0x260] ss:$20 sps:$4 sm:$0xff]  }
  0x41   : > { %1475 = vmatprep.subr.bf16.mxu0 %v4243_v24  ;;  %1604 = vmatprep.subr.bf16.mxu1 %v4245_v25  ;;  %v4297_v63 = vld [vmem:[#allocation2 + $0x25c] ss:$20 sps:$4 sm:$0xff]   ;;  %v4299_v0 = vld [vmem:[#allocation2 + $0x264] ss:$20 sps:$4 sm:$0xff]   ;;  %v173_v5 = vld [vmem:[%s4886_s4 + $0x28] sm:$0xff] }
  0x42   : > { %v4305_v3 = vld [vmem:[#allocation2 + $0x284] ss:$20 sps:$4 sm:$0xff]   ;;  %v4308_v6 = vld [vmem:[#allocation2 + $0x28c] ss:$20 sps:$4 sm:$0xff]   ;;  %v4306_v8 = vld [vmem:[#allocation2 + $0x288] ss:$20 sps:$4 sm:$0xff]  }
  0x43   : > { %v168_v4 = vld [vmem:[%s4886_s4] sm:$0xff]  ;;  %v4314_v11 = vld [vmem:[#allocation2 + $0x2b4] ss:$20 sps:$4 sm:$0xff]   ;;  %v4320_v15 = vld [vmem:[#allocation2 + $0x2dc] ss:$20 sps:$4 sm:$0xff]  }
  0x44   : > { %1476 = vmatpush1.bf16.msra.mxu0 %v4247_v26  ;;  %1605 = vmatpush1.bf16.msra.mxu1 %v4248_v27  ;;  %v4303_v7 = vld [vmem:[#allocation2 + $0x280] ss:$20 sps:$4 sm:$0xff]   ;;  %v4896_v9 = vpack.c.bf16 %v173_v5, %v168_v4  ;;  %v4309_v12 = vld [vmem:[#allocation2 + $0x2a8] ss:$20 sps:$4 sm:$0xff]   ;;  %v4312_v13 = vld [vmem:[#allocation2 + $0x2b0] ss:$20 sps:$4 sm:$0xff]  }
  0x45   : > { %1477 = vmatprep.subr.bf16.mxu0 %v4249_v28  ;;  %1606 = vmatprep.subr.bf16.mxu1 %v4251_v29  ;;  %v4311_v10 = vld [vmem:[#allocation2 + $0x2ac] ss:$20 sps:$4 sm:$0xff]   ;;  %v4317_v14 = vld [vmem:[#allocation2 + $0x2d4] ss:$20 sps:$4 sm:$0xff]   ;;  %v4315_v16 = vld [vmem:[#allocation2 + $0x2d0] ss:$20 sps:$4 sm:$0xff]  }
  0x46   : > { %v4318_v17 = vld [vmem:[#allocation2 + $0x2d8] ss:$20 sps:$4 sm:$0xff]   ;;  %v4323_v18 = vld [vmem:[#allocation2 + $0x2fc] ss:$20 sps:$4 sm:$0xff]   ;;  %v4324_v21 = vld [vmem:[#allocation2 + $0x300] ss:$20 sps:$4 sm:$0xff]  }
  0x47   : > { %v4326_v19 = vld [vmem:[#allocation2 + $0x304] ss:$20 sps:$4 sm:$0xff]   ;;  %v4332_v23 = vld [vmem:[#allocation2 + $0x32c] ss:$20 sps:$4 sm:$0xff]   ;;  %v4330_v25 = vld [vmem:[#allocation2 + $0x328] ss:$20 sps:$4 sm:$0xff]  }
  0x48   : > { %1478 = vmatpush1.bf16.msra.mxu0 %v4253_v30  ;;  %1607 = vmatpush1.bf16.msra.mxu1 %v4254_v31  ;;  %v4321_v20 = vld [vmem:[#allocation2 + $0x2f8] ss:$20 sps:$4 sm:$0xff]   ;;  %v4327_v24 = vld [vmem:[#allocation2 + $0x320] ss:$20 sps:$4 sm:$0xff]   ;;  %v4333_v28 = vld [vmem:[#allocation2 + $0x348] ss:$20 sps:$4 sm:$0xff]  }
  0x49   : > { %1479 = vmatprep.subr.bf16.mxu0 %v4255_v32  ;;  %1608 = vmatprep.subr.bf16.mxu1 %v4257_v33  ;;  %v4329_v22 = vld [vmem:[#allocation2 + $0x324] ss:$20 sps:$4 sm:$0xff]   ;;  %v4335_v26 = vld [vmem:[#allocation2 + $0x34c] ss:$20 sps:$4 sm:$0xff]   ;;  %v4338_v27 = vld [vmem:[#allocation2 + $0x354] ss:$20 sps:$4 sm:$0xff]  }
  0x4a   : > { %v4336_v29 = vld [vmem:[#allocation2 + $0x350] ss:$20 sps:$4 sm:$0xff]   ;;  %v4341_v30 = vld [vmem:[#allocation2 + $0x374] ss:$20 sps:$4 sm:$0xff]   ;;  %v171_v32 = vld [vmem:[%s4886_s4 + $0x18] sm:$0xff] }
  0x4b   : > { %v4344_v31 = vld [vmem:[#allocation2 + $0x37c] ss:$20 sps:$4 sm:$0xff]   ;;  %v176_v33 = vld [vmem:[%s4886_s4 + $0x40] sm:$0xff]  ;;  %v4362_v46 = vld [vmem:[#allocation2 + $0x3f4] ss:$20 sps:$4 sm:$0xff]  }
  0x4c   : > { %1480 = vmatpush1.bf16.msra.mxu0 %v4259_v34  ;;  %1609 = vmatpush1.bf16.msra.mxu1 %v4260_v35  ;;  %v4339_v34 = vld [vmem:[#allocation2 + $0x370] ss:$20 sps:$4 sm:$0xff]   ;;  %v4342_v35 = vld [vmem:[#allocation2 + $0x378] ss:$20 sps:$4 sm:$0xff]   ;;  %v4357_v47 = vld [vmem:[#allocation2 + $0x3e8] ss:$20 sps:$4 sm:$0xff]  }
  0x4d   : > { %1481 = vmatprep.subr.bf16.mxu0 %v4261_v36  ;;  %1610 = vmatprep.subr.bf16.mxu1 %v4263_v37  ;;  %v4902_v36 = vpack.c.bf16 %v176_v33, %v171_v32  ;;  %v4347_v37 = vld [vmem:[#allocation2 + $0x39c] ss:$20 sps:$4 sm:$0xff]   ;;  %v4390_v5 = vld [vmem:[#allocation2 + $0x4b8] ss:$20 sps:$4 sm:$0xff]   ;;  %v4423_v33 = vld [vmem:[#allocation2 + $0x5a0] ss:$20 sps:$4 sm:$0xff]  }
  0x4e   : > { %v4387_v4 = vld [vmem:[#allocation2 + $0x4b0] ss:$20 sps:$4 sm:$0xff]   ;;  %v4428_v32 = vld [vmem:[#allocation2 + $0x5ac] ss:$20 sps:$4 sm:$0xff]  }
  0x50   : > { %1482 = vmatpush1.bf16.msra.mxu0 %v4265_v38  ;;  %1611 = vmatpush1.bf16.msra.mxu1 %v4266_v39  ;;  %v4350_v38 = vld [vmem:[#allocation2 + $0x3a4] ss:$20 sps:$4 sm:$0xff]  }
  0x51   : > { %1483 = vmatprep.subr.bf16.mxu0 %v4267_v40  ;;  %1612 = vmatprep.subr.bf16.mxu1 %v4269_v41  ;;  %v4345_v39 = vld [vmem:[#allocation2 + $0x398] ss:$20 sps:$4 sm:$0xff]   ;;  %v4348_v40 = vld [vmem:[#allocation2 + $0x3a0] ss:$20 sps:$4 sm:$0xff]  }
  0x52   : > { %v4353_v41 = vld [vmem:[#allocation2 + $0x3c4] ss:$20 sps:$4 sm:$0xff]  }
  0x54   : > { %1484 = vmatpush1.bf16.msra.mxu0 %v4271_v42  ;;  %1613 = vmatpush1.bf16.msra.mxu1 %v4272_v43  ;;  %v4356_v42 = vld [vmem:[#allocation2 + $0x3cc] ss:$20 sps:$4 sm:$0xff]  }
  0x55   : > { %1485 = vmatprep.subr.bf16.mxu0 %v4273_v44  ;;  %1614 = vmatprep.subr.bf16.mxu1 %v4275_v45  ;;  %v4351_v43 = vld [vmem:[#allocation2 + $0x3c0] ss:$20 sps:$4 sm:$0xff]   ;;  %v4354_v44 = vld [vmem:[#allocation2 + $0x3c8] ss:$20 sps:$4 sm:$0xff]  }
  0x56   : > { %v4359_v45 = vld [vmem:[#allocation2 + $0x3ec] ss:$20 sps:$4 sm:$0xff]  }
  0x58   : > { %1486 = vmatpush1.bf16.msra.mxu0 %v4277_v48  ;;  %1615 = vmatpush1.bf16.msra.mxu1 %v4278_v49  ;;  %v4360_v48 = vld [vmem:[#allocation2 + $0x3f0] ss:$20 sps:$4 sm:$0xff]   ;;  %v4365_v49 = vld [vmem:[#allocation2 + $0x414] ss:$20 sps:$4 sm:$0xff]  }
  0x59   : > { %1487 = vmatprep.subr.bf16.mxu0 %v4279_v51  ;;  %1616 = vmatprep.subr.bf16.mxu1 %v4281_v52  ;;  %v4368_v51 = vld [vmem:[#allocation2 + $0x41c] ss:$20 sps:$4 sm:$0xff]  }
  0x5a   : > { %v4363_v52 = vld [vmem:[#allocation2 + $0x410] ss:$20 sps:$4 sm:$0xff]  }
  0x5c   : > { %1488 = vmatpush1.bf16.msra.mxu0 %v4283_v53  ;;  %1617 = vmatpush1.bf16.msra.mxu1 %v4284_v54  ;;  %v4366_v53 = vld [vmem:[#allocation2 + $0x418] ss:$20 sps:$4 sm:$0xff]   ;;  %v4371_v54 = vld [vmem:[#allocation2 + $0x43c] ss:$20 sps:$4 sm:$0xff]  }
  0x5d   : > { %1489 = vmatprep.subr.bf16.mxu0 %v4285_v55  ;;  %1618 = vmatprep.subr.bf16.mxu1 %v4287_v56  ;;  %v4374_v55 = vld [vmem:[#allocation2 + $0x444] ss:$20 sps:$4 sm:$0xff]  }
  0x5e   : > { %v4369_v56 = vld [vmem:[#allocation2 + $0x438] ss:$20 sps:$4 sm:$0xff]  }
  0x60   : > { %1490 = vmatpush1.bf16.msra.mxu0 %v4289_v57  ;;  %1619 = vmatpush1.bf16.msra.mxu1 %v4290_v58  ;;  %v4372_v57 = vld [vmem:[#allocation2 + $0x440] ss:$20 sps:$4 sm:$0xff]   ;;  %v4377_v58 = vld [vmem:[#allocation2 + $0x464] ss:$20 sps:$4 sm:$0xff]  }
  0x61   : > { %1491 = vmatprep.subr.bf16.mxu0 %v4291_v59  ;;  %1620 = vmatprep.subr.bf16.mxu1 %v4293_v60  ;;  %v4380_v59 = vld [vmem:[#allocation2 + $0x46c] ss:$20 sps:$4 sm:$0xff]  }
  0x62   : > { %v4375_v60 = vld [vmem:[#allocation2 + $0x460] ss:$20 sps:$4 sm:$0xff]  }
  0x64   : > { %1492 = vmatpush1.bf16.msra.mxu0 %v4295_v61  ;;  %1621 = vmatpush1.bf16.msra.mxu1 %v4296_v62  ;;  %v4378_v61 = vld [vmem:[#allocation2 + $0x468] ss:$20 sps:$4 sm:$0xff]   ;;  %v4383_v62 = vld [vmem:[#allocation2 + $0x48c] ss:$20 sps:$4 sm:$0xff]  }
  0x65   : > { %1493 = vmatprep.subr.bf16.mxu0 %v4297_v63  ;;  %1622 = vmatprep.subr.bf16.mxu1 %v4299_v0  ;;  %v4386_v63 = vld [vmem:[#allocation2 + $0x494] ss:$20 sps:$4 sm:$0xff]  }
  0x66   : > { %v4381_v0 = vld [vmem:[#allocation2 + $0x488] ss:$20 sps:$4 sm:$0xff]  }
  0x68   : > { %1494 = vmatpush1.bf16.msra.mxu0 %v4301_v1  ;;  %1623 = vmatpush1.bf16.msra.mxu1 %v4302_v2  ;;  %v4384_v1 = vld [vmem:[#allocation2 + $0x490] ss:$20 sps:$4 sm:$0xff]   ;;  %v4389_v2 = vld [vmem:[#allocation2 + $0x4b4] ss:$20 sps:$4 sm:$0xff]  }
  0x69   : > { %1506 = vmatprep.subr.bf16.mxu0 %v4305_v3  ;;  %1635 = vmatprep.subr.bf16.mxu1 %v4308_v6  ;;  %v4392_v3 = vld [vmem:[#allocation2 + $0x4bc] ss:$20 sps:$4 sm:$0xff]  }
  0x6a   : > { %v4395_v6 = vld [vmem:[#allocation2 + $0x4dc] ss:$20 sps:$4 sm:$0xff]  }
  0x6b   : > { %1496 = vmatmul.mubr.bf16.vlgmr.msra.gmra.mrb[0].mxu0 %v4896_v9  ;;  %1625 = vmatmul.mubr.bf16.vlgmr.msra.gmra.mrb[0].mxu1 %v4896_v9 }
  0x6c   : > { %1507 = vmatpush1.bf16.msra.mxu0 %v4303_v7  ;;  %1636 = vmatpush1.bf16.msra.mxu1 %v4306_v8  ;;  %v4398_v7 = vld [vmem:[#allocation2 + $0x4e4] ss:$20 sps:$4 sm:$0xff]  }
  0x6d   : > { %1508 = vmatprep.subr.bf16.mxu0 %v4311_v10  ;;  %1637 = vmatprep.subr.bf16.mxu1 %v4314_v11  ;;  %v4393_v8 = vld [vmem:[#allocation2 + $0x4d8] ss:$20 sps:$4 sm:$0xff]   ;;  %v4396_v10 = vld [vmem:[#allocation2 + $0x4e0] ss:$20 sps:$4 sm:$0xff]  }
  0x6e   : > { %1538 = vmatprep.mubr.bf16.mxu0 %v4902_v36  ;;  %1667 = vmatprep.mubr.bf16.mxu1 %v4902_v36  ;;  %v4401_v11 = vld [vmem:[#allocation2 + $0x504] ss:$20 sps:$4 sm:$0xff]  }
  0x70   : > { %1509 = vmatpush1.bf16.msra.mxu0 %v4309_v12  ;;  %1638 = vmatpush1.bf16.msra.mxu1 %v4312_v13  ;;  %v170_v12 = vld [vmem:[%s4886_s4 + $0x10] sm:$0xff]  ;;  %v175_v13 = vld [vmem:[%s4886_s4 + $0x38] sm:$0xff] }
  0x71   : > { %1510 = vmatprep.subr.bf16.mxu0 %v4317_v14  ;;  %1639 = vmatprep.subr.bf16.mxu1 %v4320_v15  ;;  %v4404_v14 = vld [vmem:[#allocation2 + $0x50c] ss:$20 sps:$4 sm:$0xff]  }
  0x72   : > { %v4399_v15 = vld [vmem:[#allocation2 + $0x500] ss:$20 sps:$4 sm:$0xff]  }
  0x74   : > { %1511 = vmatpush1.bf16.msra.mxu0 %v4315_v16  ;;  %1640 = vmatpush1.bf16.msra.mxu1 %v4318_v17  ;;  %v4402_v16 = vld [vmem:[#allocation2 + $0x508] ss:$20 sps:$4 sm:$0xff]   ;;  %v4908_v17 = vpack.c.bf16 %v175_v13, %v170_v12  ;;  %v4480_v12 = vld [vmem:[#allocation2 + $0x4c0] ss:$20 sps:$4 sm:$0xff]  }
  0x75   : > { %1512 = vmatprep.subr.bf16.mxu0 %v4323_v18  ;;  %1641 = vmatprep.subr.bf16.mxu1 %v4326_v19  ;;  %v4407_v18 = vld [vmem:[#allocation2 + $0x52c] ss:$20 sps:$4 sm:$0xff]   ;;  %v4410_v19 = vld [vmem:[#allocation2 + $0x534] ss:$20 sps:$4 sm:$0xff]  }
  0x76   : > { %v4460_v13 = vld [vmem:[#allocation2 + $0x100] ss:$20 sps:$4 sm:$0xff]  }
  0x78   : > { %1513 = vmatpush1.bf16.msra.mxu0 %v4321_v20  ;;  %1642 = vmatpush1.bf16.msra.mxu1 %v4324_v21  ;;  %v4405_v20 = vld [vmem:[#allocation2 + $0x528] ss:$20 sps:$4 sm:$0xff]   ;;  %v4408_v21 = vld [vmem:[#allocation2 + $0x530] ss:$20 sps:$4 sm:$0xff]  }
  0x79   : > { %1514 = vmatprep.subr.bf16.mxu0 %v4329_v22  ;;  %1643 = vmatprep.subr.bf16.mxu1 %v4332_v23  ;;  %v4413_v22 = vld [vmem:[#allocation2 + $0x554] ss:$20 sps:$4 sm:$0xff]   ;;  %v4416_v23 = vld [vmem:[#allocation2 + $0x55c] ss:$20 sps:$4 sm:$0xff]  }
  0x7c   : > { %1515 = vmatpush1.bf16.msra.mxu0 %v4327_v24  ;;  %1644 = vmatpush1.bf16.msra.mxu1 %v4330_v25  ;;  %v4411_v24 = vld [vmem:[#allocation2 + $0x550] ss:$20 sps:$4 sm:$0xff]   ;;  %v4810_v25 = vmov 0  }
  0x7d   : > { %1516 = vmatprep.subr.bf16.mxu0 %v4335_v26  ;;  %1645 = vmatprep.subr.bf16.mxu1 %v4338_v27  ;;  %v4414_v26 = vld [vmem:[#allocation2 + $0x558] ss:$20 sps:$4 sm:$0xff]   ;;  %v4419_v27 = vld [vmem:[#allocation2 + $0x57c] ss:$20 sps:$4 sm:$0xff]  }
  0x80   : > { %1517 = vmatpush1.bf16.msra.mxu0 %v4333_v28  ;;  %1646 = vmatpush1.bf16.msra.mxu1 %v4336_v29  ;;  %v4422_v28 = vld [vmem:[#allocation2 + $0x584] ss:$20 sps:$4 sm:$0xff]  }
  0x81   : > { %1518 = vmatprep.subr.bf16.mxu0 %v4341_v30  ;;  %1647 = vmatprep.subr.bf16.mxu1 %v4344_v31  ;;  %v4417_v29 = vld [vmem:[#allocation2 + $0x578] ss:$20 sps:$4 sm:$0xff]   ;;  %v4420_v30 = vld [vmem:[#allocation2 + $0x580] ss:$20 sps:$4 sm:$0xff]  }
  0x82   : > { %v4425_v31 = vld [vmem:[#allocation2 + $0x5a4] ss:$20 sps:$4 sm:$0xff]  }
  0x84   : > { %1519 = vmatpush1.bf16.msra.mxu0 %v4339_v34  ;;  %1648 = vmatpush1.bf16.msra.mxu1 %v4342_v35  ;;  %v4426_v34 = vld [vmem:[#allocation2 + $0x5a8] ss:$20 sps:$4 sm:$0xff]   ;;  %v4431_v35 = vld [vmem:[#allocation2 + $0x5cc] ss:$20 sps:$4 sm:$0xff]  }
  0x85   : > { %1520 = vmatprep.subr.bf16.mxu0 %v4347_v37  ;;  %1649 = vmatprep.subr.bf16.mxu1 %v4350_v38  ;;  %v4434_v37 = vld [vmem:[#allocation2 + $0x5d4] ss:$20 sps:$4 sm:$0xff]  }
  0x86   : > { %v4429_v38 = vld [vmem:[#allocation2 + $0x5c8] ss:$20 sps:$4 sm:$0xff]  }
  0x88   : > { %1521 = vmatpush1.bf16.msra.mxu0 %v4345_v39  ;;  %1650 = vmatpush1.bf16.msra.mxu1 %v4348_v40  ;;  %v4432_v39 = vld [vmem:[#allocation2 + $0x5d0] ss:$20 sps:$4 sm:$0xff]   ;;  %v4437_v40 = vld [vmem:[#allocation2 + $0x5f4] ss:$20 sps:$4 sm:$0xff]  }
  0x89   : > { %1522 = vmatprep.subr.bf16.mxu0 %v4353_v41  ;;  %1651 = vmatprep.subr.bf16.mxu1 %v4356_v42  ;;  %v4440_v41 = vld [vmem:[#allocation2 + $0x5fc] ss:$20 sps:$4 sm:$0xff]  }
  0x8a   : > { %v4435_v42 = vld [vmem:[#allocation2 + $0x5f0] ss:$20 sps:$4 sm:$0xff]  }
  0x8c   : > { %1523 = vmatpush1.bf16.msra.mxu0 %v4351_v43  ;;  %1652 = vmatpush1.bf16.msra.mxu1 %v4354_v44  ;;  %v4438_v43 = vld [vmem:[#allocation2 + $0x5f8] ss:$20 sps:$4 sm:$0xff]   ;;  %v4443_v44 = vld [vmem:[#allocation2 + $0x61c] ss:$20 sps:$4 sm:$0xff]  }
  0x8d   : > { %1524 = vmatprep.subr.bf16.mxu0 %v4359_v45  ;;  %1653 = vmatprep.subr.bf16.mxu1 %v4362_v46  ;;  %v4446_v45 = vld [vmem:[#allocation2 + $0x624] ss:$20 sps:$4 sm:$0xff]  }
  0x8e   : > { %v4441_v46 = vld [vmem:[#allocation2 + $0x618] ss:$20 sps:$4 sm:$0xff]  }
  0x90   : > { %1525 = vmatpush1.bf16.msra.mxu0 %v4357_v47  ;;  %1654 = vmatpush1.bf16.msra.mxu1 %v4360_v48  ;;  %v4444_v47 = vld [vmem:[#allocation2 + $0x620] ss:$20 sps:$4 sm:$0xff]  }
  0x91   : > { %1526 = vmatprep.subr.bf16.mxu0 %v4365_v49  ;;  %1655 = vmatprep.subr.bf16.mxu1 %v4368_v51  ;;  %v172_v48 = vld [vmem:[%s4886_s4 + $0x20] sm:$0xff]  ;;  %v177_v49 = vld [vmem:[%s4886_s4 + $0x48] sm:$0xff] }
  0x92   : > { %v4447_v51 = vld [vmem:[#allocation2 + $0x150] ss:$20 sps:$4 sm:$0xff]  }
  0x94   : > { %1527 = vmatpush1.bf16.msra.mxu0 %v4363_v52  ;;  %1656 = vmatpush1.bf16.msra.mxu1 %v4366_v53  ;;  %v4461_v52 = vld [vmem:[#allocation2 + $0x3d0] ss:$20 sps:$4 sm:$0xff]   ;;  %v4916_v53 = vpack.c.bf16 %v177_v49, %v172_v48  ;;  %v4498_v48 = vld [vmem:[#allocation2 + $0x674] ss:$20 sps:$4 sm:$0xff]  }
  0x95   : > { %1528 = vmatprep.subr.bf16.mxu0 %v4371_v54  ;;  %1657 = vmatprep.subr.bf16.mxu1 %v4374_v55  ;;  %v4448_v54 = vld [vmem:[#allocation2 + $0x10] ss:$20 sps:$4 sm:$0xff]   ;;  %v4535_v49 = vld [vmem:[#allocation2 + $0x780] ss:$20 sps:$4 sm:$0xff]  }
  0x96   : > { %v4463_v55 = vld [vmem:[#allocation2 + $0x290] ss:$20 sps:$4 sm:$0xff]  }
  0x98   : > { %1529 = vmatpush1.bf16.msra.mxu0 %v4369_v56  ;;  %1658 = vmatpush1.bf16.msra.mxu1 %v4372_v57  ;;  %v4449_v56 = vld [vmem:[#allocation2 + $0x178] ss:$20 sps:$4 sm:$0xff]  }
  0x99   : > { %1530 = vmatprep.subr.bf16.mxu0 %v4377_v58  ;;  %1659 = vmatprep.subr.bf16.mxu1 %v4380_v59  ;;  %v4465_v57 = vld [vmem:[#allocation2 + $0x3f8] ss:$20 sps:$4 sm:$0xff]  }
  0x9a   : > { %v4450_v58 = vld [vmem:[#allocation2 + $0x38] ss:$20 sps:$4 sm:$0xff]  }
  0x9b   : > { %v4466_v59 = vld [vmem:[#allocation2 + $0x2b8] ss:$20 sps:$4 sm:$0xff]  }
  0x9c   : > { %1531 = vmatpush1.bf16.msra.mxu0 %v4375_v60  ;;  %1660 = vmatpush1.bf16.msra.mxu1 %v4378_v61  ;;  %v4451_v60 = vld [vmem:[#allocation2 + $0x1a0] ss:$20 sps:$4 sm:$0xff]  }
  0x9d   : > { %1532 = vmatprep.subr.bf16.mxu0 %v4383_v62  ;;  %1661 = vmatprep.subr.bf16.mxu1 %v4386_v63  ;;  %v4468_v61 = vld [vmem:[#allocation2 + $0x420] ss:$20 sps:$4 sm:$0xff]  }
  0x9e   : > { %v4452_v62 = vld [vmem:[#allocation2 + $0x60] ss:$20 sps:$4 sm:$0xff]  }
  0x9f   : > { %v4469_v63 = vld [vmem:[#allocation2 + $0x2e0] ss:$20 sps:$4 sm:$0xff]  }
  0xa0   : > { %1533 = vmatpush1.bf16.msra.mxu0 %v4381_v0  ;;  %1662 = vmatpush1.bf16.msra.mxu1 %v4384_v1  ;;  %v4453_v0 = vld [vmem:[#allocation2 + $0x1c8] ss:$20 sps:$4 sm:$0xff]  }
  0xa1   : > { %1534 = vmatprep.subr.bf16.mxu0 %v4389_v2  ;;  %1663 = vmatprep.subr.bf16.mxu1 %v4392_v3  ;;  %v4471_v1 = vld [vmem:[#allocation2 + $0x448] ss:$20 sps:$4 sm:$0xff]  }
  0xa2   : > { %v4454_v2 = vld [vmem:[#allocation2 + $0x88] ss:$20 sps:$4 sm:$0xff]  }
  0xa3   : > { %v4472_v3 = vld [vmem:[#allocation2 + $0x308] ss:$20 sps:$4 sm:$0xff]  }
  0xa4   : > { %1535 = vmatpush1.bf16.msra.mxu0 %v4387_v4  ;;  %1664 = vmatpush1.bf16.msra.mxu1 %v4390_v5  ;;  %v4455_v4 = vld [vmem:[#allocation2 + $0x1f0] ss:$20 sps:$4 sm:$0xff]  }
  0xa5   : > { %1536 = vmatprep.subr.bf16.mxu0 %v4395_v6  ;;  %1665 = vmatprep.subr.bf16.mxu1 %v4398_v7  ;;  %v4474_v5 = vld [vmem:[#allocation2 + $0x470] ss:$20 sps:$4 sm:$0xff]   ;;  %v4457_v6 = vld [vmem:[#allocation2 + $0x218] ss:$20 sps:$4 sm:$0xff]  }
  0xa6   : > { %v4477_v7 = vld [vmem:[#allocation2 + $0x498] ss:$20 sps:$4 sm:$0xff]  }
  0xa8   : > { %1537 = vmatpush1.bf16.msra.mxu0 %v4393_v8  ;;  %1666 = vmatpush1.bf16.msra.mxu1 %v4396_v10  ;;  %v4458_v8 = vld [vmem:[#allocation2 + $0xd8] ss:$20 sps:$4 sm:$0xff]  }
  0xa9   : > { %1549 = vmatprep.subr.bf16.mxu0 %v4401_v11  ;;  %1678 = vmatprep.subr.bf16.mxu1 %v4404_v14  ;;  %v4478_v10 = vld [vmem:[#allocation2 + $0x358] ss:$20 sps:$4 sm:$0xff]   ;;  %v4459_v11 = vld [vmem:[#allocation2 + $0x240] ss:$20 sps:$4 sm:$0xff]  }
  0xaa   : > { %v4481_v14 = vld [vmem:[#allocation2 + $0x380] ss:$20 sps:$4 sm:$0xff]  }
  0xab   : > { %1539 = vmatmul.mubr.bf16.vlgmr.msra.gmra.mrb[0].mxu0 %v4908_v17  ;;  %1668 = vmatmul.mubr.bf16.vlgmr.msra.gmra.mrb[0].mxu1 %v4908_v17 }
  0xac   : > { %1550 = vmatpush1.bf16.msra.mxu0 %v4399_v15  ;;  %1679 = vmatpush1.bf16.msra.mxu1 %v4402_v16  ;;  %v4462_v15 = vld [vmem:[#allocation2 + $0x268] ss:$20 sps:$4 sm:$0xff]  }
  0xad   : > { %1551 = vmatprep.subr.bf16.mxu0 %v4407_v18  ;;  %1680 = vmatprep.subr.bf16.mxu1 %v4410_v19  ;;  %v4483_v16 = vld [vmem:[#allocation2 + $0x4e8] ss:$20 sps:$4 sm:$0xff]  }
  0xae   : > { %1581 = vmatprep.mubr.bf16.mxu0 %v4810_v25  ;;  %1710 = vmatprep.mubr.bf16.mxu1 %v4810_v25  ;;  %v4464_v18 = vld [vmem:[#allocation2 + $0x128] ss:$20 sps:$4 sm:$0xff]  }
  0xaf   : > { %v4484_v19 = vld [vmem:[#allocation2 + $0x3a8] ss:$20 sps:$4 sm:$0xff]  }
  0xb0   : > { %1552 = vmatpush1.bf16.msra.mxu0 %v4405_v20  ;;  %1681 = vmatpush1.bf16.msra.mxu1 %v4408_v21  ;;  %v4489_v20 = vld [vmem:[#allocation2 + $0x644] ss:$20 sps:$4 sm:$0xff]  }
  0xb1   : > { %1553 = vmatprep.subr.bf16.mxu0 %v4413_v22  ;;  %1682 = vmatprep.subr.bf16.mxu1 %v4416_v23  ;;  %v4467_v21 = vld [vmem:[#allocation2 + $0x510] ss:$20 sps:$4 sm:$0xff]   ;;  %v4487_v22 = vld [vmem:[#allocation2 + $0x640] ss:$20 sps:$4 sm:$0xff]  }
  0xb2   : > { %v4495_v23 = vld [vmem:[#allocation2 + $0x66c] ss:$20 sps:$4 sm:$0xff]  }
  0xb4   : > { %1554 = vmatpush1.bf16.msra.mxu0 %v4411_v24  ;;  %1683 = vmatpush1.bf16.msra.mxu1 %v4414_v26  ;;  %v4811_v24 = vmov 0.0   ;;  %v4470_v26 = vld [vmem:[#allocation2 + $0x538] ss:$20 sps:$4 sm:$0xff]  }
  0xb5   : > { %1555 = vmatprep.subr.bf16.mxu0 %v4419_v27  ;;  %1684 = vmatprep.subr.bf16.mxu1 %v4422_v28  ;;  %v4493_v27 = vld [vmem:[#allocation2 + $0x668] ss:$20 sps:$4 sm:$0xff]  }
  0xb6   : > { %v4501_v28 = vld [vmem:[#allocation2 + $0x694] ss:$20 sps:$4 sm:$0xff]  }
  0xb8   : > { %1556 = vmatpush1.bf16.msra.mxu0 %v4417_v29  ;;  %1685 = vmatpush1.bf16.msra.mxu1 %v4420_v30  ;;  %v4473_v29 = vld [vmem:[#allocation2 + $0x560] ss:$20 sps:$4 sm:$0xff]   ;;  %v4499_v30 = vld [vmem:[#allocation2 + $0x690] ss:$20 sps:$4 sm:$0xff]  }
  0xb9   : > { %1557 = vmatprep.subr.bf16.mxu0 %v4425_v31  ;;  %1686 = vmatprep.subr.bf16.mxu1 %v4428_v32  ;;  %v4507_v31 = vld [vmem:[#allocation2 + $0x6bc] ss:$20 sps:$4 sm:$0xff]   ;;  %v4513_v32 = vld [vmem:[#allocation2 + $0x6e4] ss:$20 sps:$4 sm:$0xff]  }
  0xbc   : > { %1558 = vmatpush1.bf16.msra.mxu0 %v4423_v33  ;;  %1687 = vmatpush1.bf16.msra.mxu1 %v4426_v34  ;;  %v4479_v33 = vld [vmem:[#allocation2 + $0x5b0] ss:$20 sps:$4 sm:$0xff]   ;;  %v4511_v34 = vld [vmem:[#allocation2 + $0x6e0] ss:$20 sps:$4 sm:$0xff]  }
  0xbd   : > { %1559 = vmatprep.subr.bf16.mxu0 %v4431_v35  ;;  %1688 = vmatprep.subr.bf16.mxu1 %v4434_v37  ;;  %v4519_v35 = vld [vmem:[#allocation2 + $0x70c] ss:$20 sps:$4 sm:$0xff]  }
  0xbe   : > { %v4482_v37 = vld [vmem:[#allocation2 + $0x5d8] ss:$20 sps:$4 sm:$0xff]  }
  0xc0   : > { %1560 = vmatpush1.bf16.msra.mxu0 %v4429_v38  ;;  %1689 = vmatpush1.bf16.msra.mxu1 %v4432_v39  ;;  %v4517_v38 = vld [vmem:[#allocation2 + $0x708] ss:$20 sps:$4 sm:$0xff]  }
  0xc1   : > { %1561 = vmatprep.subr.bf16.mxu0 %v4437_v40  ;;  %1690 = vmatprep.subr.bf16.mxu1 %v4440_v41  ;;  %v4525_v39 = vld [vmem:[#allocation2 + $0x734] ss:$20 sps:$4 sm:$0xff]   ;;  %v4523_v41 = vld [vmem:[#allocation2 + $0x730] ss:$20 sps:$4 sm:$0xff]  }
  0xc2   : > { %v4485_v40 = vld [vmem:[#allocation2 + $0x600] ss:$20 sps:$4 sm:$0xff]  }
  0xc4   : > { %1562 = vmatpush1.bf16.msra.mxu0 %v4435_v42  ;;  %1691 = vmatpush1.bf16.msra.mxu1 %v4438_v43  ;;  %v4531_v42 = vld [vmem:[#allocation2 + $0x75c] ss:$20 sps:$4 sm:$0xff]  }
  0xc5   : > { %1563 = vmatprep.subr.bf16.mxu0 %v4443_v44  ;;  %1692 = vmatprep.subr.bf16.mxu1 %v4446_v45  ;;  %v4486_v43 = vld [vmem:[#allocation2 + $0x628] ss:$20 sps:$4 sm:$0xff]   ;;  %v4492_v44 = vld [vmem:[#allocation2 + $0x64c] ss:$20 sps:$4 sm:$0xff]  }
  0xc6   : > { %v4529_v45 = vld [vmem:[#allocation2 + $0x758] ss:$20 sps:$4 sm:$0xff]  }
  0xc8   : > { %1564 = vmatpush1.bf16.msra.mxu0 %v4441_v46  ;;  %1693 = vmatpush1.bf16.msra.mxu1 %v4444_v47  ;;  %v4537_v46 = vld [vmem:[#allocation2 + $0x784] ss:$20 sps:$4 sm:$0xff]   ;;  %v4490_v47 = vld [vmem:[#allocation2 + $0x648] ss:$20 sps:$4 sm:$0xff]  }
  0xc9   : > { %4004 = vmatprep.subr.bf16.mxu0 %v4447_v51  ;;  %4026 = vmatprep.subr.bf16.mxu1 %v4461_v52  ;;  %v4543_v51 = vld [vmem:[#allocation2 + $0x7ac] ss:$20 sps:$4 sm:$0xff]   ;;  %v4496_v52 = vld [vmem:[#allocation2 + $0x670] ss:$20 sps:$4 sm:$0xff]  }
  0xcb   : > { %1582 = vmatmul.mubr.bf16.vlgmr.msra.gmra.mrb[0].mxu0 %v4916_v53  ;;  %1711 = vmatmul.mubr.bf16.vlgmr.msra.gmra.mrb[0].mxu1 %v4916_v53 }
  0xcc   : > { %4005 = vmatpush3.bf16.msra.mxu0 %v4448_v54  ;;  %4027 = vmatpush3.bf16.msra.mxu1 %v4463_v55  ;;  %v4504_v54 = vld [vmem:[#allocation2 + $0x69c] ss:$20 sps:$4 sm:$0xff]  }
  0xcd   : > { %4006 = vmatprep.subr.bf16.mxu0 %v4449_v56  ;;  %4028 = vmatprep.subr.bf16.mxu1 %v4465_v57  ;;  %v4541_v55 = vld [vmem:[#allocation2 + $0x7a8] ss:$20 sps:$4 sm:$0xff]   ;;  %v4502_v57 = vld [vmem:[#allocation2 + $0x698] ss:$20 sps:$4 sm:$0xff]  }
  0xce   : > { %1753 = vmatprep.mubr.bf16.mxu0 %v4890_v50  ;;  %1794 = vmatprep.mubr.bf16.mxu1 %v4902_v36  ;;  %v4456_v50 = vld [vmem:[#allocation2 + $0xb0] ss:$20 sps:$4 sm:$0xff]   ;;  %v4549_v56 = vld [vmem:[#allocation2 + $0x7d4] ss:$20 sps:$4 sm:$0xff]  }
  0xcf   : > { %v4475_v36 = vld [vmem:[#allocation2 + $0x330] ss:$20 sps:$4 sm:$0xff]  }
  0xd0   : > { %4007 = vmatpush3.bf16.msra.mxu0 %v4450_v58  ;;  %4029 = vmatpush3.bf16.msra.mxu1 %v4466_v59  ;;  %v4510_v58 = vld [vmem:[#allocation2 + $0x6c4] ss:$20 sps:$4 sm:$0xff]  }
  0xd1   : > { %4008 = vmatprep.subr.bf16.mxu0 %v4451_v60  ;;  %4030 = vmatprep.subr.bf16.mxu1 %v4468_v61  ;;  %v4547_v59 = vld [vmem:[#allocation2 + $0x7d0] ss:$20 sps:$4 sm:$0xff]   ;;  %v4508_v61 = vld [vmem:[#allocation2 + $0x6c0] ss:$20 sps:$4 sm:$0xff]  }
  0xd2   : > { %v4555_v60 = vld [vmem:[#allocation2 + $0x7fc] ss:$20 sps:$4 sm:$0xff]  }
  0xd4   : > { %4009 = vmatpush3.bf16.msra.mxu0 %v4452_v62  ;;  %4031 = vmatpush3.bf16.msra.mxu1 %v4469_v63  ;;  %v4516_v62 = vld [vmem:[#allocation2 + $0x6ec] ss:$20 sps:$4 sm:$0xff]  }
  0xd5   : > { %4010 = vmatprep.subr.bf16.mxu0 %v4453_v0  ;;  %4032 = vmatprep.subr.bf16.mxu1 %v4471_v1  ;;  %v4553_v63 = vld [vmem:[#allocation2 + $0x7f8] ss:$20 sps:$4 sm:$0xff]   ;;  %v4514_v0 = vld [vmem:[#allocation2 + $0x6e8] ss:$20 sps:$4 sm:$0xff]  }
  0xd6   : > { %v4522_v1 = vld [vmem:[#allocation2 + $0x714] ss:$20 sps:$4 sm:$0xff]  }
  0xd8   : > { %4011 = vmatpush3.bf16.msra.mxu0 %v4454_v2  ;;  %4033 = vmatpush3.bf16.msra.mxu1 %v4472_v3  ;;  %v4559_v2 = vld [vmem:[#allocation2 + $0x820] ss:$20 sps:$4 sm:$0xff]  }
  0xd9   : > { %4012 = vmatprep.subr.bf16.mxu0 %v4455_v4  ;;  %4034 = vmatprep.subr.bf16.mxu1 %v4474_v5  ;;  %v4567_v3 = vld [vmem:[#allocation2 + $0x84c] ss:$20 sps:$4 sm:$0xff]   ;;  %v4520_v4 = vld [vmem:[#allocation2 + $0x710] ss:$20 sps:$4 sm:$0xff]  }
  0xda   : > { %v4528_v5 = vld [vmem:[#allocation2 + $0x73c] ss:$20 sps:$4 sm:$0xff]  }
  0xdc   : > { %4013 = vmatpush3.bf16.msra.mxu0 %v4456_v50  ;;  %4035 = vmatpush3.bf16.msra.mxu1 %v4475_v36  ;;  %v4565_v50 = vld [vmem:[#allocation2 + $0x848] ss:$20 sps:$4 sm:$0xff]   ;;  %v4526_v36 = vld [vmem:[#allocation2 + $0x738] ss:$20 sps:$4 sm:$0xff]  }
  0xdd   : > { %4014 = vmatprep.subr.bf16.mxu0 %v4457_v6  ;;  %4036 = vmatprep.subr.bf16.mxu1 %v4477_v7  ;;  %v4573_v6 = vld [vmem:[#allocation2 + $0x874] ss:$20 sps:$4 sm:$0xff]   ;;  %v4534_v7 = vld [vmem:[#allocation2 + $0x764] ss:$20 sps:$4 sm:$0xff]  }
  0xe0   : > { %4015 = vmatpush3.bf16.msra.mxu0 %v4458_v8  ;;  %4037 = vmatpush3.bf16.msra.mxu1 %v4478_v10  ;;  %v4571_v8 = vld [vmem:[#allocation2 + $0x870] ss:$20 sps:$4 sm:$0xff]  }
  0xe1   : > { %4016 = vmatprep.subr.bf16.mxu0 %v4459_v11  ;;  %4038 = vmatprep.subr.bf16.mxu1 %v4480_v12  ;;  %v4579_v10 = vld [vmem:[#allocation2 + $0x89c] ss:$20 sps:$4 sm:$0xff]   ;;  %v4532_v11 = vld [vmem:[#allocation2 + $0x760] ss:$20 sps:$4 sm:$0xff]  }
  0xe2   : > { %v4540_v12 = vld [vmem:[#allocation2 + $0x78c] ss:$20 sps:$4 sm:$0xff]  }
  0xe4   : > { %4017 = vmatpush3.bf16.msra.mxu0 %v4460_v13  ;;  %4039 = vmatpush3.bf16.msra.mxu1 %v4481_v14  ;;  %v4577_v13 = vld [vmem:[#allocation2 + $0x898] ss:$20 sps:$4 sm:$0xff]  }
  0xe5   : > { %4018 = vmatprep.subr.bf16.mxu0 %v4462_v15  ;;  %4040 = vmatprep.subr.bf16.mxu1 %v4483_v16  ;;  %v4585_v14 = vld [vmem:[#allocation2 + $0x8c4] ss:$20 sps:$4 sm:$0xff]   ;;  %v4538_v15 = vld [vmem:[#allocation2 + $0x788] ss:$20 sps:$4 sm:$0xff]  }
  0xe6   : > { %v4546_v16 = vld [vmem:[#allocation2 + $0x7b4] ss:$20 sps:$4 sm:$0xff]  }
  0xe8   : > { %4019 = vmatpush3.bf16.msra.mxu0 %v4464_v18  ;;  %4041 = vmatpush3.bf16.msra.mxu1 %v4484_v19  ;;  %v4544_v18 = vld [vmem:[#allocation2 + $0x7b0] ss:$20 sps:$4 sm:$0xff]  }
  0xe9   : > { %4110 = vmatprep.subr.bf16.mxu0 %v4811_v24  ;;  %3130 = vmatprep.subr.bf16.mxu1 %v4489_v20  ;;  %v4552_v19 = vld [vmem:[#allocation2 + $0x7dc] ss:$20 sps:$4 sm:$0xff]   ;;  %v4550_v20 = vld [vmem:[#allocation2 + $0x7d8] ss:$20 sps:$4 sm:$0xff]  }
  0xeb   : > { %1754 = vmatmul.mubr.bf16.vlgmr.msra.gmra.mrb[4].mxu0 %v4896_v9  ;;  %1795 = vmatmul.mubr.bf16.vlgmr.msra.gmra.mrb[4].mxu1 %v4908_v17  ;;  %v4476_v9 = vld [vmem:[#allocation2 + $0x588] ss:$20 sps:$4 sm:$0xff]   ;;  %v4505_v17 = vld [vmem:[#allocation2 + $0x6b8] ss:$20 sps:$4 sm:$0xff]  }
  0xec   : > { %4111 = vmatpush3.bf16.msra.mxu0 %v4467_v21  ;;  %4126 = vmatprep.mubr.msk.bf16.mxu0 %vm4812_vm0, %v4811_v24  ;;  %v4558_v21 = vld [vmem:[#allocation2 + $0x804] ss:$20 sps:$4 sm:$0xff]  }
  0xed   : > { %4112 = vmatprep.subr.bf16.mxu0 %v4811_v24  ;;  %3131 = vmatpush1.bf16.msra.mxu1 %v4487_v22  ;;  %v4556_v22 = vld [vmem:[#allocation2 + $0x800] ss:$20 sps:$4 sm:$0xff]  }
  0xee   : > { %3132 = vmatprep.subr.bf16.mxu1 %v4495_v23  ;;  %v4564_v23 = vld [vmem:[#allocation2 + $0x82c] ss:$20 sps:$4 sm:$0xff]  }
  0xf0   : > { %4113 = vmatpush3.bf16.msra.mxu0 %v4470_v26  ;;  %v4562_v26 = vld [vmem:[#allocation2 + $0x828] ss:$20 sps:$4 sm:$0xff]  }
  0xf1   : > { %4114 = vmatprep.subr.bf16.mxu0 %v4811_v24  ;;  %3133 = vmatpush1.bf16.msra.mxu1 %v4493_v27  ;;  %v4570_v27 = vld [vmem:[#allocation2 + $0x854] ss:$20 sps:$4 sm:$0xff]  }
  0xf2   : > { %3134 = vmatprep.subr.bf16.mxu1 %v4501_v28  ;;  %v4568_v28 = vld [vmem:[#allocation2 + $0x850] ss:$20 sps:$4 sm:$0xff]  }
  0xf4   : > { %4115 = vmatpush3.bf16.msra.mxu0 %v4473_v29  ;;  %v4576_v29 = vld [vmem:[#allocation2 + $0x87c] ss:$20 sps:$4 sm:$0xff]  }
  0xf5   : > { %4116 = vmatprep.subr.bf16.mxu0 %v4811_v24  ;;  %3135 = vmatpush1.bf16.msra.mxu1 %v4499_v30  ;;  %v4574_v30 = vld [vmem:[#allocation2 + $0x878] ss:$20 sps:$4 sm:$0xff]  }
  0xf6   : > { %3136 = vmatprep.subr.bf16.mxu1 %v4507_v31  ;;  %v4582_v31 = vld [vmem:[#allocation2 + $0x8a4] ss:$20 sps:$4 sm:$0xff]  }
  0xf8   : > { %4117 = vmatpush3.bf16.msra.mxu0 %v4476_v9  ;;  %v4580_v9 = vld [vmem:[#allocation2 + $0x8a0] ss:$20 sps:$4 sm:$0xff]  }
  0xf9   : > { %4118 = vmatprep.subr.bf16.mxu0 %v4811_v24  ;;  %3137 = vmatpush1.bf16.msra.mxu1 %v4505_v17  ;;  %v4588_v17 = vld [vmem:[#allocation2 + $0x8cc] ss:$20 sps:$4 sm:$0xff]  }
  0xfa   : > { %3138 = vmatprep.subr.bf16.mxu1 %v4513_v32 }
  0xfc   : > { %4119 = vmatpush3.bf16.msra.mxu0 %v4479_v33 }
  0xfd   : > { %4120 = vmatprep.subr.bf16.mxu0 %v4811_v24  ;;  %3139 = vmatpush1.bf16.msra.mxu1 %v4511_v34 }
  0xfe   : > { %3140 = vmatprep.subr.bf16.mxu1 %v4519_v35 }
 0x100   : > { %4121 = vmatpush3.bf16.msra.mxu0 %v4482_v37 }
 0x101   : > { %4122 = vmatprep.subr.bf16.mxu0 %v4811_v24  ;;  %3141 = vmatpush1.bf16.msra.mxu1 %v4517_v38 }
 0x102   : > { %3142 = vmatprep.subr.bf16.mxu1 %v4525_v39 }
 0x104   : > { %4123 = vmatpush3.bf16.msra.mxu0 %v4485_v40 }
 0x105   : > { %4124 = vmatprep.subr.bf16.mxu0 %v4811_v24  ;;  %3143 = vmatpush1.bf16.msra.mxu1 %v4523_v41 }
 0x106   : > { %3144 = vmatprep.subr.bf16.mxu1 %v4531_v42 }
 0x108   : > { %4125 = vmatpush3.bf16.msra.mxu0 %v4486_v43 }
 0x109   : > { %3259 = vmatprep.subr.bf16.mxu0 %v4492_v44  ;;  %3145 = vmatpush1.bf16.msra.mxu1 %v4529_v45  ;;  %v4583_v45 = vld [vmem:[#allocation2 + $0x8c0] ss:$20 sps:$4 sm:$0xff]  }
 0x10a   : > { %3146 = vmatprep.subr.bf16.mxu1 %v4537_v46  ;;  %v4586_v46 = vld [vmem:[#allocation2 + $0x8c8] ss:$20 sps:$4 sm:$0xff]  }
 0x10b   : > { %4127 = vmatmul.mubr.bf16.vlgmr.msra.gmra.mrb[8].mxu0 %v4916_v53  ;;  %v4561_v53 = vld [vmem:[#allocation2 + $0x824] ss:$20 sps:$4 sm:$0xff]  }
 0x10c   : > { %3260 = vmatpush1.bf16.msra.mxu0 %v4490_v47  ;;  %v4591_v47 = vld [vmem:[#allocation2 + $0x8ec] ss:$20 sps:$4 sm:$0xff]  }
 0x10d   : > { %3261 = vmatprep.subr.bf16.mxu0 %v4498_v48  ;;  %3147 = vmatpush1.bf16.msra.mxu1 %v4535_v49  ;;  %v4594_v48 = vld [vmem:[#allocation2 + $0x8f4] ss:$20 sps:$4 sm:$0xff]  }
 0x10e   : > { %3148 = vmatprep.subr.bf16.mxu1 %v4543_v51  ;;  %v4589_v49 = vld [vmem:[#allocation2 + $0x8e8] ss:$20 sps:$4 sm:$0xff]   ;;  %v4592_v51 = vld [vmem:[#allocation2 + $0x8f0] ss:$20 sps:$4 sm:$0xff]  }
 0x110   : > { %3262 = vmatpush1.bf16.msra.mxu0 %v4496_v52  ;;  %v4597_v52 = vld [vmem:[#allocation2 + $0x914] ss:$20 sps:$4 sm:$0xff]  }
 0x111   : > { %3263 = vmatprep.subr.bf16.mxu0 %v4504_v54  ;;  %3149 = vmatpush1.bf16.msra.mxu1 %v4541_v55  ;;  %v4600_v54 = vld [vmem:[#allocation2 + $0x91c] ss:$20 sps:$4 sm:$0xff]  }
 0x112   : > { %3150 = vmatprep.subr.bf16.mxu1 %v4549_v56  ;;  %v4595_v55 = vld [vmem:[#allocation2 + $0x910] ss:$20 sps:$4 sm:$0xff]   ;;  %v4598_v56 = vld [vmem:[#allocation2 + $0x918] ss:$20 sps:$4 sm:$0xff]  }
 0x114   : > { %3264 = vmatpush1.bf16.msra.mxu0 %v4502_v57  ;;  %v4603_v57 = vld [vmem:[#allocation2 + $0x93c] ss:$20 sps:$4 sm:$0xff]  }
 0x115   : > { %3265 = vmatprep.subr.bf16.mxu0 %v4510_v58  ;;  %3151 = vmatpush1.bf16.msra.mxu1 %v4547_v59  ;;  %v4606_v58 = vld [vmem:[#allocation2 + $0x944] ss:$20 sps:$4 sm:$0xff]  }
 0x116   : > { %3152 = vmatprep.subr.bf16.mxu1 %v4555_v60  ;;  %v4601_v59 = vld [vmem:[#allocation2 + $0x938] ss:$20 sps:$4 sm:$0xff]   ;;  %v4604_v60 = vld [vmem:[#allocation2 + $0x940] ss:$20 sps:$4 sm:$0xff]  }
 0x118   : > { %3266 = vmatpush1.bf16.msra.mxu0 %v4508_v61  ;;  %v4609_v61 = vld [vmem:[#allocation2 + $0x964] ss:$20 sps:$4 sm:$0xff]  }
 0x119   : > { %3267 = vmatprep.subr.bf16.mxu0 %v4516_v62  ;;  %3153 = vmatpush1.bf16.msra.mxu1 %v4553_v63  ;;  %v4612_v62 = vld [vmem:[#allocation2 + $0x96c] ss:$20 sps:$4 sm:$0xff]  }
 0x11a   : > { %3154 = vmatprep.subr.bf16.mxu1 %v4561_v53  ;;  %v4607_v63 = vld [vmem:[#allocation2 + $0x960] ss:$20 sps:$4 sm:$0xff]   ;;  %v4610_v53 = vld [vmem:[#allocation2 + $0x968] ss:$20 sps:$4 sm:$0xff]  }
 0x11c   : > { %3268 = vmatpush1.bf16.msra.mxu0 %v4514_v0  ;;  %v4615_v0 = vld [vmem:[#allocation2 + $0x98c] ss:$20 sps:$4 sm:$0xff]  }
 0x11d   : > { %3269 = vmatprep.subr.bf16.mxu0 %v4522_v1  ;;  %3155 = vmatpush1.bf16.msra.mxu1 %v4559_v2  ;;  %v4618_v1 = vld [vmem:[#allocation2 + $0x994] ss:$20 sps:$4 sm:$0xff]  }
 0x11e   : > { %3156 = vmatprep.subr.bf16.mxu1 %v4567_v3  ;;  %v4613_v2 = vld [vmem:[#allocation2 + $0x988] ss:$20 sps:$4 sm:$0xff]   ;;  %v4616_v3 = vld [vmem:[#allocation2 + $0x990] ss:$20 sps:$4 sm:$0xff]  }
 0x120   : > { %3270 = vmatpush1.bf16.msra.mxu0 %v4520_v4  ;;  %v4621_v4 = vld [vmem:[#allocation2 + $0x9b4] ss:$20 sps:$4 sm:$0xff]  }
 0x121   : > { %3271 = vmatprep.subr.bf16.mxu0 %v4528_v5  ;;  %3157 = vmatpush1.bf16.msra.mxu1 %v4565_v50  ;;  %v4624_v5 = vld [vmem:[#allocation2 + $0x9bc] ss:$20 sps:$4 sm:$0xff]  }
 0x122   : > { %3158 = vmatprep.subr.bf16.mxu1 %v4573_v6  ;;  %v4619_v50 = vld [vmem:[#allocation2 + $0x9b0] ss:$20 sps:$4 sm:$0xff]  }
 0x123   : > { %v4627_v6 = vld [vmem:[#allocation2 + $0x9dc] ss:$20 sps:$4 sm:$0xff]  }
 0x124   : > { %3272 = vmatpush1.bf16.msra.mxu0 %v4526_v36  ;;  %v4622_v36 = vld [vmem:[#allocation2 + $0x9b8] ss:$20 sps:$4 sm:$0xff]  }
 0x125   : > { %3273 = vmatprep.subr.bf16.mxu0 %v4534_v7  ;;  %3159 = vmatpush1.bf16.msra.mxu1 %v4571_v8  ;;  %v4630_v7 = vld [vmem:[#allocation2 + $0x9e4] ss:$20 sps:$4 sm:$0xff]  }
 0x126   : > { %3160 = vmatprep.subr.bf16.mxu1 %v4579_v10  ;;  %v4625_v8 = vld [vmem:[#allocation2 + $0x9d8] ss:$20 sps:$4 sm:$0xff]   ;;  %v4628_v10 = vld [vmem:[#allocation2 + $0x9e0] ss:$20 sps:$4 sm:$0xff]  }
 0x128   : > { %3274 = vmatpush1.bf16.msra.mxu0 %v4532_v11 }
 0x129   : > { %3275 = vmatprep.subr.bf16.mxu0 %v4540_v12  ;;  %3161 = vmatpush1.bf16.msra.mxu1 %v4577_v13  ;;  %v4633_v13 = vld [vmem:[#allocation2 + $0xa04] ss:$20 sps:$4 sm:$0xff]  }
 0x12a   : > { %3173 = vmatprep.subr.bf16.mxu1 %v4585_v14  ;;  %v4636_v14 = vld [vmem:[#allocation2 + $0xa0c] ss:$20 sps:$4 sm:$0xff]  }
 0x12c   : > { %3276 = vmatpush1.bf16.msra.mxu0 %v4538_v15 }
 0x12d   : > { %3277 = vmatprep.subr.bf16.mxu0 %v4546_v16 }
 0x130   : > { %3278 = vmatpush1.bf16.msra.mxu0 %v4544_v18 }
 0x131   : > { %3279 = vmatprep.subr.bf16.mxu0 %v4552_v19 }
 0x134   : > { %3280 = vmatpush1.bf16.msra.mxu0 %v4550_v20 }
 0x135   : > { %3281 = vmatprep.subr.bf16.mxu0 %v4558_v21 }
 0x138   : > { %3282 = vmatpush1.bf16.msra.mxu0 %v4556_v22 }
 0x139   : > { %3283 = vmatprep.subr.bf16.mxu0 %v4564_v23 }
 0x13c   : > { %3284 = vmatpush1.bf16.msra.mxu0 %v4562_v26  ;;  %v4631_v26 = vld [vmem:[#allocation2 + $0xa00] ss:$20 sps:$4 sm:$0xff]  }
 0x13d   : > { %3285 = vmatprep.subr.bf16.mxu0 %v4570_v27  ;;  %v4634_v27 = vld [vmem:[#allocation2 + $0xa08] ss:$20 sps:$4 sm:$0xff]  }
 0x140   : > { %3286 = vmatpush1.bf16.msra.mxu0 %v4568_v28 }
 0x141   : > { %3287 = vmatprep.subr.bf16.mxu0 %v4576_v29 }
 0x144   : > { %3288 = vmatpush1.bf16.msra.mxu0 %v4574_v30 }
 0x145   : > { %3289 = vmatprep.subr.bf16.mxu0 %v4582_v31  ;;  %v4639_v31 = vld [vmem:[#allocation2 + $0xa2c] ss:$20 sps:$4 sm:$0xff]  }
 0x148   : > { %3290 = vmatpush1.bf16.msra.mxu0 %v4580_v9  ;;  %v4642_v9 = vld [vmem:[#allocation2 + $0xa34] ss:$20 sps:$4 sm:$0xff]  }
 0x149   : > { %3302 = vmatprep.subr.bf16.mxu0 %v4588_v17 }
 0x19e   : > { %v1583_v32 = vpop.f32.mrb[0].mxu0  ;;  %v1712_v33 = vpop.f32.mrb[0].mxu1 }
 0x19f   : > { %v1585_v34 = vpop.f32.mrb[1].mxu0  ;;  %v1714_v35 = vpop.f32.mrb[1].mxu1 }
 0x1a0   : > { %v1587_v37 = vpop.f32.mrb[2].mxu0  ;;  %v1716_v38 = vpop.f32.mrb[2].mxu1 }
 0x1a1   : > { %v4935_v39 = vpack.c.bf16 %v1587_v37, %v1583_v32  ;;  %v4937_v40 = vpack.c.bf16 %v1716_v38, %v1712_v33  ;;  %v1589_v41 = vpop.f32.mrb[3].mxu0  ;;  %v1718_v42 = vpop.f32.mrb[3].mxu1  ;;  %v4637_v32 = vld [vmem:[#allocation2 + $0xa28] ss:$20 sps:$4 sm:$0xff]   ;;  %v4640_v33 = vld [vmem:[#allocation2 + $0xa30] ss:$20 sps:$4 sm:$0xff]  }
 0x1a2   : > { %v4939_v43 = vpack.c.bf16 %v1589_v41, %v1585_v34  ;;  %v4941_v44 = vpack.c.bf16 %v1718_v42, %v1714_v35  ;;  %v4645_v34 = vld [vmem:[#allocation2 + $0xa54] ss:$20 sps:$4 sm:$0xff]   ;;  %v4648_v35 = vld [vmem:[#allocation2 + $0xa5c] ss:$20 sps:$4 sm:$0xff]   ;;  %v4646_v38 = vld [vmem:[#allocation2 + $0xa58] ss:$20 sps:$4 sm:$0xff]  }
 0x1a3   : > { %v4643_v37 = vld [vmem:[#allocation2 + $0xa50] ss:$20 sps:$4 sm:$0xff]  }
 0x1a4   : > { %3162 = vmatprep.mubr.bf16.mxu1 %v4939_v43  ;;  %3291 = vmatprep.mubr.bf16.mxu0 %v4939_v43  ;;  %v4651_v41 = vld [vmem:[#allocation2 + $0xa7c] ss:$20 sps:$4 sm:$0xff]   ;;  %v4654_v42 = vld [vmem:[#allocation2 + $0xa84] ss:$20 sps:$4 sm:$0xff]  }
 0x1a5   : > { %3163 = vmatmul.mubr.bf16.vlgmr.msra.gmra.mrb[8].mxu1 %v4935_v39  ;;  %3292 = vmatmul.mubr.bf16.vlgmr.msra.gmra.mrb[12].mxu0 %v4935_v39 }
 0x1a6   : > { %3174 = vmatpush1.bf16.msra.mxu1 %v4583_v45  ;;  %3303 = vmatpush1.bf16.msra.mxu0 %v4586_v46  ;;  %v4649_v45 = vld [vmem:[#allocation2 + $0xa78] ss:$20 sps:$4 sm:$0xff]   ;;  %v4652_v46 = vld [vmem:[#allocation2 + $0xa80] ss:$20 sps:$4 sm:$0xff]  }
 0x1a7   : > { %3205 = vmatprep.mubr.bf16.mxu1 %v4941_v44  ;;  %3334 = vmatprep.mubr.bf16.mxu0 %v4941_v44 }
 0x1a8   : > { %3175 = vmatprep.subr.bf16.mxu1 %v4591_v47  ;;  %3304 = vmatprep.subr.bf16.mxu0 %v4594_v48  ;;  %v4657_v47 = vld [vmem:[#allocation2 + $0xaa4] ss:$20 sps:$4 sm:$0xff]   ;;  %v4660_v48 = vld [vmem:[#allocation2 + $0xaac] ss:$20 sps:$4 sm:$0xff]  }
 0x1aa   : > { %3176 = vmatpush1.bf16.msra.mxu1 %v4589_v49  ;;  %3305 = vmatpush1.bf16.msra.mxu0 %v4592_v51  ;;  %v4655_v49 = vld [vmem:[#allocation2 + $0xaa0] ss:$20 sps:$4 sm:$0xff]   ;;  %v4658_v51 = vld [vmem:[#allocation2 + $0xaa8] ss:$20 sps:$4 sm:$0xff]  }
 0x1ab   : > { %3177 = vmatprep.subr.bf16.mxu1 %v4597_v52  ;;  %3306 = vmatprep.subr.bf16.mxu0 %v4600_v54  ;;  %v4663_v52 = vld [vmem:[#allocation2 + $0xacc] ss:$20 sps:$4 sm:$0xff]   ;;  %v4666_v54 = vld [vmem:[#allocation2 + $0xad4] ss:$20 sps:$4 sm:$0xff]  }
 0x1ae   : > { %3178 = vmatpush1.bf16.msra.mxu1 %v4595_v55  ;;  %3307 = vmatpush1.bf16.msra.mxu0 %v4598_v56  ;;  %v4661_v55 = vld [vmem:[#allocation2 + $0xac8] ss:$20 sps:$4 sm:$0xff]   ;;  %v4664_v56 = vld [vmem:[#allocation2 + $0xad0] ss:$20 sps:$4 sm:$0xff]  }
 0x1af   : > { %3179 = vmatprep.subr.bf16.mxu1 %v4603_v57  ;;  %3308 = vmatprep.subr.bf16.mxu0 %v4606_v58  ;;  %v4669_v57 = vld [vmem:[#allocation2 + $0xaf4] ss:$20 sps:$4 sm:$0xff]   ;;  %v4672_v58 = vld [vmem:[#allocation2 + $0xafc] ss:$20 sps:$4 sm:$0xff]  }
 0x1b2   : > { %3180 = vmatpush1.bf16.msra.mxu1 %v4601_v59  ;;  %3309 = vmatpush1.bf16.msra.mxu0 %v4604_v60  ;;  %v4667_v59 = vld [vmem:[#allocation2 + $0xaf0] ss:$20 sps:$4 sm:$0xff]   ;;  %v4670_v60 = vld [vmem:[#allocation2 + $0xaf8] ss:$20 sps:$4 sm:$0xff]  }
 0x1b3   : > { %3181 = vmatprep.subr.bf16.mxu1 %v4609_v61  ;;  %3310 = vmatprep.subr.bf16.mxu0 %v4612_v62  ;;  %v4675_v61 = vld [vmem:[#allocation2 + $0xb1c] ss:$20 sps:$4 sm:$0xff]   ;;  %v4678_v62 = vld [vmem:[#allocation2 + $0xb24] ss:$20 sps:$4 sm:$0xff]  }
 0x1b6   : > { %3182 = vmatpush1.bf16.msra.mxu1 %v4607_v63  ;;  %3311 = vmatpush1.bf16.msra.mxu0 %v4610_v53  ;;  %v4673_v63 = vld [vmem:[#allocation2 + $0xb18] ss:$20 sps:$4 sm:$0xff]   ;;  %v4676_v53 = vld [vmem:[#allocation2 + $0xb20] ss:$20 sps:$4 sm:$0xff]  }
 0x1b7   : > { %3183 = vmatprep.subr.bf16.mxu1 %v4615_v0  ;;  %3312 = vmatprep.subr.bf16.mxu0 %v4618_v1 }
 0x1ba   : > { %3184 = vmatpush1.bf16.msra.mxu1 %v4613_v2  ;;  %3313 = vmatpush1.bf16.msra.mxu0 %v4616_v3  ;;  %v4681_v3 = vld [vmem:[#allocation2 + $0xb44] ss:$20 sps:$4 sm:$0xff]  }
 0x1bb   : > { %3185 = vmatprep.subr.bf16.mxu1 %v4621_v4  ;;  %3314 = vmatprep.subr.bf16.mxu0 %v4624_v5  ;;  %v4684_v4 = vld [vmem:[#allocation2 + $0xb4c] ss:$20 sps:$4 sm:$0xff]  }
 0x1be   : > { %3186 = vmatpush1.bf16.msra.mxu1 %v4619_v50  ;;  %3315 = vmatpush1.bf16.msra.mxu0 %v4622_v36  ;;  %v4020_v11 = vpop.f32.mrb[4].mxu0  ;;  %v4042_v12 = vpop.f32.mrb[4].mxu1 }
 0x1bf   : > { %3187 = vmatprep.subr.bf16.mxu1 %v4627_v6  ;;  %3316 = vmatprep.subr.bf16.mxu0 %v4630_v7  ;;  %v4021_v15 = vpop.f32.mrb[5].mxu0  ;;  %v4043_v16 = vpop.f32.mrb[5].mxu1  ;;  %v4679_v6 = vld [vmem:[#allocation2 + $0xb40] ss:$20 sps:$4 sm:$0xff]   ;;  %v4682_v7 = vld [vmem:[#allocation2 + $0xb48] ss:$20 sps:$4 sm:$0xff]  }
 0x1c0   : > { %v4022_v18 = vadd.f32 %v4021_v15, %v4020_v11  ;;  %v4044_v19 = vadd.f32 %v4043_v16, %v4042_v12  ;;  %v4023_v20 = vpop.f32.mrb[6].mxu0  ;;  %v4045_v21 = vpop.f32.mrb[6].mxu1  ;;  %v4690_v11 = vld [vmem:[#allocation2 + $0xb74] ss:$20 sps:$4 sm:$0xff]   ;;  %v4696_v15 = vld [vmem:[#allocation2 + $0xb9c] ss:$20 sps:$4 sm:$0xff]  }
 0x1c1   : > { %v4024_v22 = vpop.f32.mrb[7].mxu0  ;;  %v4046_v23 = vpop.f32.mrb[7].mxu1  ;;  %v4685_v12 = vld [vmem:[#allocation2 + $0xb68] ss:$20 sps:$4 sm:$0xff]   ;;  %v4691_v16 = vld [vmem:[#allocation2 + $0xb90] ss:$20 sps:$4 sm:$0xff]  }
 0x1c2   : > { %3188 = vmatpush1.bf16.msra.mxu1 %v4625_v8  ;;  %3317 = vmatpush1.bf16.msra.mxu0 %v4628_v10  ;;  %v4025_v28 = vadd.f32 %v4024_v22, %v4023_v20  ;;  %v4047_v29 = vadd.f32 %v4046_v23, %v4045_v21  ;;  %v1797_v30 = vadd.f32 %v4044_v19, %v4022_v18  ;;  %v4687_v10 = vld [vmem:[#allocation2 + $0xb6c] ss:$20 sps:$4 sm:$0xff]   ;;  %v4699_v19 = vld [vmem:[#allocation2 + $0xbbc] ss:$20 sps:$4 sm:$0xff]   ;;  %v4702_v20 = vld [vmem:[#allocation2 + $0xbc4] ss:$20 sps:$4 sm:$0xff]  }
 0x1c3   : > { %3189 = vmatprep.subr.bf16.mxu1 %v4633_v13  ;;  %3318 = vmatprep.subr.bf16.mxu0 %v4636_v14  ;;  %v4688_v13 = vld [vmem:[#allocation2 + $0xb70] ss:$20 sps:$4 sm:$0xff]   ;;  %v4693_v14 = vld [vmem:[#allocation2 + $0xb94] ss:$20 sps:$4 sm:$0xff]   ;;  %v4694_v18 = vld [vmem:[#allocation2 + $0xb98] ss:$20 sps:$4 sm:$0xff]  }
 0x1c4   : > { %v1800_v17 = vadd.f32 %v4047_v29, %v4025_v28  ;;  %v4697_v21 = vld [vmem:[#allocation2 + $0xbb8] ss:$20 sps:$4 sm:$0xff]   ;;  %v4700_v22 = vld [vmem:[#allocation2 + $0xbc0] ss:$20 sps:$4 sm:$0xff]  }
 0x1c5   : > { %v4705_v23 = vld [vmem:[#allocation2 + $0xbe4] ss:$20 sps:$4 sm:$0xff]   ;;  %v4711_v28 = vld [vmem:[#allocation2 + $0xc0c] ss:$20 sps:$4 sm:$0xff]   ;;  %v4714_v29 = vld [vmem:[#allocation2 + $0xc14] ss:$20 sps:$4 sm:$0xff]  }
 0x1c6   : > { %3190 = vmatpush1.bf16.msra.mxu1 %v4631_v26  ;;  %3319 = vmatpush1.bf16.msra.mxu0 %v4634_v27  ;;  %v4708_v26 = vld [vmem:[#allocation2 + $0xbec] ss:$20 sps:$4 sm:$0xff]  }
 0x1c7   : > { %3191 = vmatprep.subr.bf16.mxu1 %v4639_v31  ;;  %3320 = vmatprep.subr.bf16.mxu0 %v4642_v9  ;;  %v4703_v27 = vld [vmem:[#allocation2 + $0xbe0] ss:$20 sps:$4 sm:$0xff]   ;;  %v4712_v31 = vld [vmem:[#allocation2 + $0xc10] ss:$20 sps:$4 sm:$0xff]  }
 0x1c8   : > { %v4717_v9 = vld [vmem:[#allocation2 + $0xc34] ss:$20 sps:$4 sm:$0xff]  }
 0x1ca   : > { %3192 = vmatpush1.bf16.msra.mxu1 %v4637_v32  ;;  %3321 = vmatpush1.bf16.msra.mxu0 %v4640_v33  ;;  %v4715_v32 = vld [vmem:[#allocation2 + $0xc30] ss:$20 sps:$4 sm:$0xff]   ;;  %v4718_v33 = vld [vmem:[#allocation2 + $0xc38] ss:$20 sps:$4 sm:$0xff]  }
 0x1cb   : > { %3193 = vmatprep.subr.bf16.mxu1 %v4645_v34  ;;  %3322 = vmatprep.subr.bf16.mxu0 %v4648_v35  ;;  %v4723_v34 = vld [vmem:[#allocation2 + $0xc5c] ss:$20 sps:$4 sm:$0xff]   ;;  %v4726_v35 = vld [vmem:[#allocation2 + $0xc64] ss:$20 sps:$4 sm:$0xff]  }
 0x1ce   : > { %3194 = vmatpush1.bf16.msra.mxu1 %v4643_v37  ;;  %3323 = vmatpush1.bf16.msra.mxu0 %v4646_v38  ;;  %v4721_v37 = vld [vmem:[#allocation2 + $0xc58] ss:$20 sps:$4 sm:$0xff]   ;;  %v4724_v38 = vld [vmem:[#allocation2 + $0xc60] ss:$20 sps:$4 sm:$0xff]  }
 0x1cf   : > { %3195 = vmatprep.subr.bf16.mxu1 %v4651_v41  ;;  %3324 = vmatprep.subr.bf16.mxu0 %v4654_v42  ;;  %v4727_v41 = vld [vmem:[#allocation2 + $0x790] ss:$20 sps:$4 sm:$0xff]  }
 0x1d0   : > { %v4728_v42 = vld [vmem:[#allocation2 + $0xa10] ss:$20 sps:$4 sm:$0xff]  }
 0x1d2   : > { %3196 = vmatpush1.bf16.msra.mxu1 %v4649_v45  ;;  %3325 = vmatpush1.bf16.msra.mxu0 %v4652_v46  ;;  %v4729_v45 = vld [vmem:[#allocation2 + $0x650] ss:$20 sps:$4 sm:$0xff]  }
 0x1d3   : > { %3197 = vmatprep.subr.bf16.mxu1 %v4657_v47  ;;  %3326 = vmatprep.subr.bf16.mxu0 %v4660_v48  ;;  %v4730_v46 = vld [vmem:[#allocation2 + $0x8d0] ss:$20 sps:$4 sm:$0xff]   ;;  %v4731_v47 = vld [vmem:[#allocation2 + $0x7b8] ss:$20 sps:$4 sm:$0xff]  }
 0x1d4   : > { %v4732_v48 = vld [vmem:[#allocation2 + $0xa38] ss:$20 sps:$4 sm:$0xff]  }
 0x1d6   : > { %3198 = vmatpush1.bf16.msra.mxu1 %v4655_v49  ;;  %3327 = vmatpush1.bf16.msra.mxu0 %v4658_v51  ;;  %v4733_v49 = vld [vmem:[#allocation2 + $0x678] ss:$20 sps:$4 sm:$0xff]  }
 0x1d7   : > { %3199 = vmatprep.subr.bf16.mxu1 %v4663_v52  ;;  %3328 = vmatprep.subr.bf16.mxu0 %v4666_v54  ;;  %v4734_v51 = vld [vmem:[#allocation2 + $0x8f8] ss:$20 sps:$4 sm:$0xff]   ;;  %v4735_v52 = vld [vmem:[#allocation2 + $0x7e0] ss:$20 sps:$4 sm:$0xff]  }
 0x1d8   : > { %v4736_v54 = vld [vmem:[#allocation2 + $0xa60] ss:$20 sps:$4 sm:$0xff]  }
 0x1da   : > { %3200 = vmatpush1.bf16.msra.mxu1 %v4661_v55  ;;  %3329 = vmatpush1.bf16.msra.mxu0 %v4664_v56  ;;  %v4737_v55 = vld [vmem:[#allocation2 + $0x6a0] ss:$20 sps:$4 sm:$0xff]  }
 0x1db   : > { %3201 = vmatprep.subr.bf16.mxu1 %v4669_v57  ;;  %3330 = vmatprep.subr.bf16.mxu0 %v4672_v58  ;;  %v4738_v56 = vld [vmem:[#allocation2 + $0x920] ss:$20 sps:$4 sm:$0xff]   ;;  %v4739_v57 = vld [vmem:[#allocation2 + $0x808] ss:$20 sps:$4 sm:$0xff]  }
 0x1dc   : > { %v4740_v58 = vld [vmem:[#allocation2 + $0xa88] ss:$20 sps:$4 sm:$0xff]  }
 0x1de   : > { %3202 = vmatpush1.bf16.msra.mxu1 %v4667_v59  ;;  %3331 = vmatpush1.bf16.msra.mxu0 %v4670_v60  ;;  %v1837_v0 = vpop.f32.mrb[8].mxu0  ;;  %v4741_v59 = vld [vmem:[#allocation2 + $0x6c8] ss:$20 sps:$4 sm:$0xff]   ;;  %v4743_v60 = vld [vmem:[#allocation2 + $0x830] ss:$20 sps:$4 sm:$0xff]  }
 0x1df   : > { %3203 = vmatprep.subr.bf16.mxu1 %v4675_v61  ;;  %3332 = vmatprep.subr.bf16.mxu0 %v4678_v62  ;;  %v1838_v1 = vadd.f32 %v1837_v0, %v1797_v30  ;;  %v4128_v2 = vpop.f32.mrb[9].mxu0  ;;  %v4709_v30 = vld [vmem:[#allocation2 + $0xc08] ss:$20 sps:$4 sm:$0xff]   ;;  %v4745_v61 = vld [vmem:[#allocation2 + $0x6f0] ss:$20 sps:$4 sm:$0xff]  }
 0x1e0   : > { %v1840_v5 = vpop.f32.mrb[10].mxu0  ;;  %v4746_v62 = vld [vmem:[#allocation2 + $0x970] ss:$20 sps:$4 sm:$0xff]   ;;  %v4749_v0 = vld [vmem:[#allocation2 + $0x718] ss:$20 sps:$4 sm:$0xff]  }
 0x1e1   : > { %v1841_v50 = vadd.f32 %v1840_v5, %v1800_v17  ;;  %v4129_v36 = vpop.f32.mrb[11].mxu0  ;;  %v4720_v17 = vld [vmem:[#allocation2 + $0xc3c] ss:$20 sps:$4 sm:$0xff]   ;;  %v4751_v2 = vld [vmem:[#allocation2 + $0x880] ss:$20 sps:$4 sm:$0xff]  }
 0x1e2   : > { %3204 = vmatpush1.bf16.msra.mxu1 %v4673_v63  ;;  %3333 = vmatpush1.bf16.msra.mxu0 %v4676_v53  ;;  %v4747_v63 = vld [vmem:[#allocation2 + $0x858] ss:$20 sps:$4 sm:$0xff]   ;;  %v4754_v5 = vld [vmem:[#allocation2 + $0x9c0] ss:$20 sps:$4 sm:$0xff]   ;;  %v4756_v36 = vld [vmem:[#allocation2 + $0xb28] ss:$20 sps:$4 sm:$0xff]  }
 0x1e3   : > { %v4949_v8 = vpack.c.bf16 %v1841_v50, %v1838_v1  ;;  %3216 = vmatprep.subr.bf16.mxu1 %v4681_v3  ;;  %3345 = vmatprep.subr.bf16.mxu0 %v4684_v4  ;;  %v4748_v53 = vld [vmem:[#allocation2 + $0xad8] ss:$20 sps:$4 sm:$0xff]   ;;  %v4752_v3 = vld [vmem:[#allocation2 + $0xb00] ss:$20 sps:$4 sm:$0xff]   ;;  %v4755_v50 = vld [vmem:[#allocation2 + $0x8a8] ss:$20 sps:$4 sm:$0xff]  }
 0x1e4   : > { %v4750_v1 = vld [vmem:[#allocation2 + $0x998] ss:$20 sps:$4 sm:$0xff]   ;;  %v4753_v4 = vld [vmem:[#allocation2 + $0x740] ss:$20 sps:$4 sm:$0xff]  }
 0x1e5   : > { %3206 = vmatmul.mubr.bf16.vlgmr.msra.gmra.mrb[8].mxu1 %v4937_v40  ;;  %3335 = vmatmul.mubr.bf16.vlgmr.msra.gmra.mrb[12].mxu0 %v4937_v40 }
 0x1e6   : > { %3217 = vmatpush1.bf16.msra.mxu1 %v4679_v6  ;;  %3346 = vmatpush1.bf16.msra.mxu0 %v4682_v7  ;;  %v4757_v6 = vld [vmem:[#allocation2 + $0x768] ss:$20 sps:$4 sm:$0xff]  }
 0x1e7   : > { %3218 = vmatprep.subr.bf16.mxu1 %v4687_v10  ;;  %3347 = vmatprep.subr.bf16.mxu0 %v4690_v11  ;;  %v4758_v7 = vld [vmem:[#allocation2 + $0x9e8] ss:$20 sps:$4 sm:$0xff]   ;;  %v4759_v10 = vld [vmem:[#allocation2 + $0xb50] ss:$20 sps:$4 sm:$0xff]   ;;  %v4760_v11 = vld [vmem:[#allocation2 + $0xb78] ss:$20 sps:$4 sm:$0xff]  }
 0x1e8   : > { %3248 = vmatprep.mubr.bf16.mxu1 %v4810_v25  ;;  %3377 = vmatprep.mubr.bf16.mxu0 %v4810_v25  ;;  %v4706_v25 = vld [vmem:[#allocation2 + $0xbe8] ss:$20 sps:$4 sm:$0xff]  }
 0x1ea   : > { %3219 = vmatpush1.bf16.msra.mxu1 %v4685_v12  ;;  %3348 = vmatpush1.bf16.msra.mxu0 %v4688_v13  ;;  %v4761_v12 = vld [vmem:[#allocation2 + $0xba0] ss:$20 sps:$4 sm:$0xff]   ;;  %v4762_v13 = vld [vmem:[#allocation2 + $0xbc8] ss:$20 sps:$4 sm:$0xff]  }
 0x1eb   : > { %3220 = vmatprep.subr.bf16.mxu1 %v4693_v14  ;;  %3349 = vmatprep.subr.bf16.mxu0 %v4696_v15  ;;  %v4765_v14 = vld [vmem:[#allocation2 + $0xc40] ss:$20 sps:$4 sm:$0xff]   ;;  %v4766_v15 = vld [vmem:[#allocation2 + $0xc68] ss:$20 sps:$4 sm:$0xff]  }
 0x1ee   : > { %3221 = vmatpush1.bf16.msra.mxu1 %v4691_v16  ;;  %3350 = vmatpush1.bf16.msra.mxu0 %v4694_v18 }
 0x1ef   : > { %3222 = vmatprep.subr.bf16.mxu1 %v4699_v19  ;;  %3351 = vmatprep.subr.bf16.mxu0 %v4702_v20 }
 0x1f2   : > { %3223 = vmatpush1.bf16.msra.mxu1 %v4697_v21  ;;  %3352 = vmatpush1.bf16.msra.mxu0 %v4700_v22 }
 0x1f3   : > { %3224 = vmatprep.subr.bf16.mxu1 %v4705_v23  ;;  %3353 = vmatprep.subr.bf16.mxu0 %v4708_v26 }
 0x1f6   : > { %3225 = vmatpush1.bf16.msra.mxu1 %v4703_v27  ;;  %3354 = vmatpush1.bf16.msra.mxu0 %v4706_v25 }
 0x1f7   : > { %3226 = vmatprep.subr.bf16.mxu1 %v4711_v28  ;;  %3355 = vmatprep.subr.bf16.mxu0 %v4714_v29 }
 0x1fa   : > { %3227 = vmatpush1.bf16.msra.mxu1 %v4709_v30  ;;  %3356 = vmatpush1.bf16.msra.mxu0 %v4712_v31 }
 0x1fb   : > { %3228 = vmatprep.subr.bf16.mxu1 %v4717_v9  ;;  %3357 = vmatprep.subr.bf16.mxu0 %v4720_v17 }
 0x1fe   : > { %3229 = vmatpush1.bf16.msra.mxu1 %v4715_v32  ;;  %3358 = vmatpush1.bf16.msra.mxu0 %v4718_v33 }
 0x1ff   : > { %3230 = vmatprep.subr.bf16.mxu1 %v4723_v34  ;;  %3359 = vmatprep.subr.bf16.mxu0 %v4726_v35 }
 0x202   : > { %3231 = vmatpush1.bf16.msra.mxu1 %v4721_v37  ;;  %3360 = vmatpush1.bf16.msra.mxu0 %v4724_v38 }
 0x203   : > { %4057 = vmatprep.subr.bf16.mxu1 %v4727_v41  ;;  %4079 = vmatprep.subr.bf16.mxu0 %v4728_v42 }
 0x205   : > { %3249 = vmatmul.mubr.bf16.vlgmr.msra.gmra.mrb[8].mxu1 %v4949_v8  ;;  %3378 = vmatmul.mubr.bf16.vlgmr.msra.gmra.mrb[12].mxu0 %v4949_v8 }
 0x206   : > { %4058 = vmatpush3.bf16.msra.mxu1 %v4729_v45  ;;  %3420 = vmatprep.mubr.bf16.mxu1 %v4939_v43  ;;  %v4742_v43 = vld [vmem:[#allocation2 + $0x948] ss:$20 sps:$4 sm:$0xff]  }
 0x207   : > { %4080 = vmatpush3.bf16.msra.mxu0 %v4730_v46  ;;  %3461 = vmatprep.mubr.bf16.mxu0 %v4941_v44  ;;  %v4744_v44 = vld [vmem:[#allocation2 + $0xab0] ss:$20 sps:$4 sm:$0xff]  }
 0x208   : > { %4059 = vmatprep.subr.bf16.mxu1 %v4731_v47  ;;  %4081 = vmatprep.subr.bf16.mxu0 %v4732_v48 }
 0x20a   : > { %4060 = vmatpush3.bf16.msra.mxu1 %v4733_v49 }
 0x20b   : > { %4082 = vmatpush3.bf16.msra.mxu0 %v4734_v51  ;;  %4061 = vmatprep.subr.bf16.mxu1 %v4735_v52 }
 0x20c   : > { %4083 = vmatprep.subr.bf16.mxu0 %v4736_v54 }
 0x20e   : > { %4062 = vmatpush3.bf16.msra.mxu1 %v4737_v55 }
 0x20f   : > { %4084 = vmatpush3.bf16.msra.mxu0 %v4738_v56  ;;  %4063 = vmatprep.subr.bf16.mxu1 %v4739_v57 }
 0x210   : > { %4085 = vmatprep.subr.bf16.mxu0 %v4740_v58 }
 0x212   : > { %4064 = vmatpush3.bf16.msra.mxu1 %v4741_v59 }
 0x213   : > { %4086 = vmatpush3.bf16.msra.mxu0 %v4742_v43  ;;  %4065 = vmatprep.subr.bf16.mxu1 %v4743_v60 }
 0x214   : > { %4087 = vmatprep.subr.bf16.mxu0 %v4744_v44 }
 0x216   : > { %4066 = vmatpush3.bf16.msra.mxu1 %v4745_v61 }
 0x217   : > { %4088 = vmatpush3.bf16.msra.mxu0 %v4746_v62  ;;  %4067 = vmatprep.subr.bf16.mxu1 %v4747_v63 }
 0x218   : > { %4089 = vmatprep.subr.bf16.mxu0 %v4748_v53 }
 0x21a   : > { %4068 = vmatpush3.bf16.msra.mxu1 %v4749_v0 }
 0x21b   : > { %4090 = vmatpush3.bf16.msra.mxu0 %v4750_v1  ;;  %4069 = vmatprep.subr.bf16.mxu1 %v4751_v2 }
 0x21c   : > { %4091 = vmatprep.subr.bf16.mxu0 %v4752_v3 }
 0x21e   : > { %4070 = vmatpush3.bf16.msra.mxu1 %v4753_v4 }
 0x21f   : > { %4092 = vmatpush3.bf16.msra.mxu0 %v4754_v5  ;;  %4071 = vmatprep.subr.bf16.mxu1 %v4755_v50 }
 0x220   : > { %4093 = vmatprep.subr.bf16.mxu0 %v4756_v36 }
 0x222   : > { %4072 = vmatpush3.bf16.msra.mxu1 %v4757_v6 }
 0x223   : > { %4094 = vmatpush3.bf16.msra.mxu0 %v4758_v7  ;;  %4130 = vmatprep.subr.bf16.mxu1 %v4811_v24 }
 0x225   : > { %3421 = vmatmul.mubr.bf16.vlgmr.msra.gmra.mrb[12].mxu1 %v4935_v39  ;;  %v4763_v39 = vld [vmem:[#allocation2 + $0xbf0] ss:$20 sps:$4 sm:$0xff]  }
 0x226   : > { %3462 = vmatmul.mubr.bf16.vlgmr.msra.gmra.mrb[16].mxu0 %v4937_v40  ;;  %4131 = vmatpush3.bf16.msra.mxu1 %v4759_v10  ;;  %v4764_v40 = vld [vmem:[#allocation2 + $0xc18] ss:$20 sps:$4 sm:$0xff]  }
 0x227   : > { %4132 = vmatprep.subr.bf16.mxu1 %v4811_v24  ;;  %4146 = vmatprep.mubr.msk.bf16.mxu1 %vm4812_vm0, %v4811_v24 }
 0x22a   : > { %4133 = vmatpush3.bf16.msra.mxu1 %v4760_v11 }
 0x22b   : > { %4134 = vmatprep.subr.bf16.mxu1 %v4811_v24 }
 0x22e   : > { %4135 = vmatpush3.bf16.msra.mxu1 %v4761_v12 }
 0x22f   : > { %4136 = vmatprep.subr.bf16.mxu1 %v4811_v24 }
 0x232   : > { %4137 = vmatpush3.bf16.msra.mxu1 %v4762_v13 }
 0x233   : > { %4138 = vmatprep.subr.bf16.mxu1 %v4811_v24 }
 0x236   : > { %4139 = vmatpush3.bf16.msra.mxu1 %v4763_v39 }
 0x237   : > { %4140 = vmatprep.subr.bf16.mxu1 %v4811_v24 }
 0x23a   : > { %4141 = vmatpush3.bf16.msra.mxu1 %v4764_v40 }
 0x23b   : > { %4142 = vmatprep.subr.bf16.mxu1 %v4811_v24 }
 0x23e   : > { %4143 = vmatpush3.bf16.msra.mxu1 %v4765_v14 }
 0x23f   : > { %4144 = vmatprep.subr.bf16.mxu1 %v4811_v24 }
 0x242   : > { %4145 = vmatpush3.bf16.msra.mxu1 %v4766_v15 }
 0x245   : > { %4147 = vmatmul.mubr.bf16.vlgmr.msra.gmra.mrb[16].mxu1 %v4949_v8 }
 0x2d8   : > { %v3250_v16 = vpop.f32.mrb[8].mxu1  ;;  %v3379_v18 = vpop.f32.mrb[12].mxu0 }
 0x2d9   : > { %3511 = vst [vmem:[%s4977_s7] sm:$0xff] %v3250_v16  ;;  %3513 = vst [vmem:[%s4977_s7 + $0x10] sm:$0xff] %v3379_v18  ;;  %v3252_v24 = vpop.f32.mrb[9].mxu1  ;;  %v3381_v8 = vpop.f32.mrb[13].mxu0 }
 0x2da   : > { %3512 = vst [vmem:[%s4977_s7 + $0x8] sm:$0xff] %v3252_v24  ;;  %3514 = vst [vmem:[%s4977_s7 + $0x18] sm:$0xff] %v3381_v8  ;;  %v3254_v19 = vpop.f32.mrb[10].mxu1  ;;  %v3383_v20 = vpop.f32.mrb[14].mxu0 }
 0x2db   : > { %3516 = vst [vmem:[%s4977_s7 + $0x28] sm:$0xff] %v3254_v19  ;;  %3518 = vst [vmem:[%s4977_s7 + $0x38] sm:$0xff] %v3383_v20  ;;  %v3256_v21 = vpop.f32.mrb[11].mxu1  ;;  %v3385_v22 = vpop.f32.mrb[15].mxu0 }
 0x2dc   : > { %3517 = vst [vmem:[%s4977_s7 + $0x30] sm:$0xff] %v3256_v21  ;;  %3519 = vst [vmem:[%s4977_s7 + $0x40] sm:$0xff] %v3385_v22 }
 0x2f8   : > { %v4073_v23 = vpop.f32.mrb[12].mxu1 }
 0x2f9   : > { %v4095_v26 = vpop.f32.mrb[16].mxu0  ;;  %v4074_v27 = vpop.f32.mrb[13].mxu1 }
 0x2fa   : > { %v4075_v25 = vadd.f32 %v4074_v27, %v4073_v23  ;;  %v4096_v28 = vpop.f32.mrb[17].mxu0  ;;  %v4076_v29 = vpop.f32.mrb[14].mxu1 }
 0x2fb   : > { %v4097_v30 = vadd.f32 %v4096_v28, %v4095_v26  ;;  %v4098_v31 = vpop.f32.mrb[18].mxu0  ;;  %v4077_v9 = vpop.f32.mrb[15].mxu1 }
 0x2fc   : > { %v4078_v17 = vadd.f32 %v4077_v9, %v4076_v29  ;;  %v4099_v32 = vpop.f32.mrb[19].mxu0 }
 0x2fd   : > { %v4100_v33 = vadd.f32 %v4099_v32, %v4098_v31  ;;  %v3464_v34 = vadd.f32 %v4097_v30, %v4075_v25 }
 0x2ff   : > { %v3467_v35 = vadd.f32 %v4100_v33, %v4078_v17 }
 0x318   : > { %v3504_v37 = vpop.f32.mrb[16].mxu1 }
 0x319   : > { %v3505_v38 = vadd.f32 %v3504_v37, %v3464_v34  ;;  %v4148_v41 = vpop.f32.mrb[17].mxu1 }
 0x31a   : > { %v3507_v42 = vpop.f32.mrb[18].mxu1 }
 0x31b   : > { %3515 = vst [vmem:[%s4977_s7 + $0x20] sm:$0xff] %v3505_v38  ;;  %v3508_v45 = vadd.f32 %v3507_v42, %v3467_v35  ;;  %v4149_v46 = vpop.f32.mrb[19].mxu1 }
 0x31d   : > { %3520 = vst [vmem:[%s4977_s7 + $0x48] sm:$0xff] %v3508_v45 }
 0x31e PF: > { %s13_s9 = sadd.s32 1, %s4805_s9  }
 0x31f   : > { %p10_p3 = scmp.ge.s32.totalorder %s13_s9, 4  }
 0x321   :  { %12 = sbr.rel (!%p10_p3) target bundleno = 1 (0x1), region = 64 }
 0x328   :  { %3545 = vsyncpa [#allocation3], 1 }
 0x329   :  { %3547 = vsyncpa [#allocation3 + $0x1], 1 }

</bundles_post_ra>
